<compile_context>
chip_gen: v7x
topology: tpu7x:2x2x1
jax: 0.10.0
libtpu: 0.0.40
codegen_flags: <defaults>
</compile_context>

<pallas_src>
import functools

import jax
import jax.numpy as jnp
from jax.experimental import pallas as pl
from jax.experimental.pallas import tpu as pltpu


def _round_up(n, m):
    return ((n + m - 1) // m) * m


def _conformer_conv_kernel(
    x_hbm, w1a_ref, b1a_ref, w1g_ref, b1g_ref, dw_ref, sh_ref, w2_ref, b2_ref,
    o_ref, x_buf, dma_sem, u_ref,
    *, d_true, n_lane_pad, s_true, ts, win, padl, kernel_size,
):
    b = pl.program_id(0)
    t = pl.program_id(1)
    num_t = pl.num_programs(1)
    slot = jax.lax.rem(t, 2)

    # ---- manual halo DMA: window t covers padded-seq rows [t*ts, t*ts + win) ----
    def window(tt):
        start = pl.multiple_of(tt * ts, 8)
        return x_hbm.at[b, pl.ds(start, win), :]

    @pl.when(t == 0)                        # first tile of this batch: blocking fetch
    def _():
        pltpu.make_async_copy(window(0), x_buf.at[0], dma_sem.at[0]).start()

    pltpu.make_async_copy(window(t), x_buf.at[slot], dma_sem.at[slot]).wait()

    @pl.when(t + 1 < num_t)                 # prefetch next seq tile of the same batch
    def _():
        pltpu.make_async_copy(window(t + 1), x_buf.at[1 - slot],
                              dma_sem.at[1 - slot]).start()

    x = x_buf[slot].astype(jnp.float32)     # (win, Dp)

    # ---- LayerNorm statistics (gamma/beta folded into W1/b1 on the host) ----
    inv_d = 1.0 / d_true
    mean = jnp.sum(x, axis=-1, keepdims=True) * inv_d
    xc = x - mean
    sumsq = jnp.sum(xc * xc, axis=-1, keepdims=True)
    if n_lane_pad:                          # padded lanes hold x = 0 -> xc = -mean
        sumsq = sumsq - n_lane_pad * (mean * mean)
    var = jnp.maximum(sumsq * inv_d, 0.0)
    xn = (xc * jax.lax.rsqrt(var + 1e-5)).astype(w1a_ref.dtype)

    # ---- pointwise_conv1 split into the two GLU halves; GLU fused immediately ----
    a = jnp.dot(xn, w1a_ref[...], preferred_element_type=jnp.float32) + b1a_ref[...]
    g = jnp.dot(xn, w1g_ref[...], preferred_element_type=jnp.float32) + b1g_ref[...]
    u = a * jax.nn.sigmoid(g)

    # Zero rows outside the true sequence ('same' conv zero-padding + seq-tile padding).
    row = t * ts + jax.lax.broadcasted_iota(jnp.int32, (win, 1), 0) - padl
    u = jnp.where((row >= 0) & (row < s_true), u, 0.0)
    u_ref[...] = u                          # stage GLU output in VMEM scratch

    # ---- depthwise (1, K) conv along seq: shifted ref windows (BN folded into taps) ----
    v = u_ref[pl.ds(0, ts), :] * dw_ref[0:1, :]
    for k in range(1, kernel_size):         # unrolled K-tap MAC (VPU)
        v = v + u_ref[pl.ds(k, ts), :] * dw_ref[k:k + 1, :]
    v = v + sh_ref[...]                     # conv bias + BatchNorm shift (folded)
    v = v * jax.nn.sigmoid(v)               # SiLU   (dropout = identity in eval mode)

    # ---- pointwise_conv2 ----
    y = jnp.dot(v.astype(w2_ref.dtype), w2_ref[...],
                preferred_element_type=jnp.float32) + b2_ref[...]
    o_ref[0] = y.astype(o_ref.dtype)


def conformer_convolution(
    x, ln_gamma, ln_beta, w1, b1, dw, dw_b,
    bn_gamma, bn_beta, bn_mean, bn_var, w2, b2,
    *, kernel_size, bn_eps=1e-5, seq_tile=256, matmul_dtype=jnp.bfloat16,
):
    """x: [B, S, D] -> [B, S, D].

    Weight layouts (row-major "in, out" views of the PyTorch Conv2d weights):
      w1: (D, 2*inner), b1: (2*inner,)        # pointwise_conv1
      dw: (K, inner),   dw_b: (inner,)        # depthwise conv
      w2: (inner, D),   b2: (D,)              # pointwise_conv2
    """
    B, S, D = x.shape
    inner = w1.shape[1] // 2
    K = kernel_size
    f32 = jnp.float32

    # Channel padding to multiples of 128 -> lane-dense matmuls / output stores.
    Dp = _round_up(D, 128)
    Ip = _round_up(inner, 128)
    pd, pi = Dp - D, Ip - inner

    # Sequence tiling with halo.
    TS = _round_up(min(seq_tile, _round_up(S, 8)), 8)
    S_pad = _round_up(S, TS)
    num_t = S_pad // TS
    PADL = (K - 1) // 2                     # 'same' conv left padding
    HALO = _round_up(K - 1, 8)              # halo rows fetched past each tile
    WIN = TS + HALO                         # fetched/recomputed window rows
    Kp = _round_up(max(K, 1), 8)

    # Pad x: PADL rows left, enough right so every halo window is in bounds,
    # channels to Dp (only when needed).
    pr = S_pad + HALO - PADL - S
    if PADL or pr or pd:
        xp = jnp.pad(x, ((0, 0), (PADL, pr), (0, pd)))
    else:
        xp = x

    # Fold LayerNorm affine into pointwise_conv1; split into the two GLU halves.
    g32, bt32 = ln_gamma.astype(f32), ln_beta.astype(f32)
    w1f = w1.astype(f32)
    w1a = w1f[:, :inner] * g32[:, None]
    w1g = w1f[:, inner:] * g32[:, None]
    b1a = b1[:inner].astype(f32) + bt32 @ w1f[:, :inner]
    b1g = b1[inner:].astype(f32) + bt32 @ w1f[:, inner:]
    w1a_p = jnp.pad(w1a, ((0, pd), (0, pi))).astype(matmul_dtype)
    w1g_p = jnp.pad(w1g, ((0, pd), (0, pi))).astype(matmul_dtype)
    b1a_p = jnp.pad(b1a, (0, pi)).reshape(1, Ip)
    b1g_p = jnp.pad(b1g, (0, pi)).reshape(1, Ip)

    # Fold BatchNorm (eval, running stats) into depthwise taps + one shift.
    bn_scale = bn_gamma.astype(f32) * jax.lax.rsqrt(bn_var.astype(f32) + bn_eps)
    bn_shift = bn_beta.astype(f32) - bn_mean.astype(f32) * bn_scale
    dw_f = dw.astype(f32) * bn_scale[None, :]
    sh_f = dw_b.astype(f32) * bn_scale + bn_shift
    dw_p = jnp.pad(dw_f, ((0, Kp - K), (0, pi)))          # (Kp, Ip), sublane-aligned
    sh_p = jnp.pad(sh_f, (0, pi)).reshape(1, Ip)

    w2_p = jnp.pad(w2, ((0, pi), (0, pd))).astype(matmul_dtype)   # (Ip, Dp)
    b2_p = jnp.pad(b2.astype(f32), (0, pd)).reshape(1, Dp)

    kernel = functools.partial(
        _conformer_conv_kernel,
        d_true=float(D), n_lane_pad=int(pd), s_true=int(S),
        ts=int(TS), win=int(WIN), padl=int(PADL), kernel_size=int(K))

    itemsize = jnp.dtype(x.dtype).itemsize
    w_itemsize = jnp.dtype(matmul_dtype).itemsize
    cost = pl.CostEstimate(
        flops=int(B * num_t * (2 * WIN * Dp * 2 * Ip + 2 * TS * Ip * Dp
                               + 2 * TS * Ip * K)),
        transcendentals=int(B * num_t * (WIN + TS) * Ip),
        bytes_accessed=int(B * num_t * (WIN + TS) * Dp * itemsize
                           + (w1a_p.size + w1g_p.size + w2_p.size) * w_itemsize
                           + (2 * Ip + Kp * Ip + Ip + Dp) * 4),
    )

    def const(shape):
        return pl.BlockSpec(shape, lambda i, j: (0, 0))

    out_p = pl.pallas_call(
        kernel,
        out_shape=jax.ShapeDtypeStruct((B, S_pad, Dp), x.dtype),
        grid_spec=pltpu.PrefetchScalarGridSpec(
            num_scalar_prefetch=0,
            grid=(B, num_t),                # batch x seq-tiles
            in_specs=[
                pl.BlockSpec(memory_space=pl.ANY),   # x in HBM: manual halo DMA
                const((Dp, Ip)),                     # W1a (LN-folded)
                const((1, Ip)),                      # b1a
                const((Dp, Ip)),                     # W1g (LN-folded)
                const((1, Ip)),                      # b1g
                const((Kp, Ip)),                     # depthwise taps (BN-folded)
                const((1, Ip)),                      # conv bias + BN shift (folded)
                const((Ip, Dp)),                     # W2
                const((1, Dp)),                      # b2
            ],
            out_specs=pl.BlockSpec((1, TS, Dp), lambda i, j: (i, j, 0)),
            scratch_shapes=[
                pltpu.VMEM((2, WIN, Dp), x.dtype),   # double-buffered x window
                pltpu.SemaphoreType.DMA((2,)),
                pltpu.VMEM((WIN, Ip), f32),          # staged GLU output u
            ],
        ),
        compiler_params=pltpu.CompilerParams(
            # Seq-tile axis must stay "arbitrary": the manual prefetch carries state
            # across t steps.  Batch axis shards across TensorCores (megacore / v7x).
            dimension_semantics=("parallel", "arbitrary"),
            vmem_limit_bytes=48 * 1024 * 1024,
        ),
        cost_estimate=cost,
    )(xp, w1a_p, b1a_p, w1g_p, b1g_p, dw_p, sh_p, w2_p, b2_p)

    if S_pad != S or Dp != D:
        out_p = out_p[:, :S, :D]
    return out_p


def _reference(x, ln_gamma, ln_beta, w1, b1, dw, dw_b,
               bn_gamma, bn_beta, bn_mean, bn_var, w2, b2, *, kernel_size):
    """Pure-JAX f32 reference of the PyTorch forward (cache=None, eval mode)."""
    B, S, D = x.shape
    inner = w1.shape[1] // 2
    xf = x.astype(jnp.float32)
    mean = jnp.mean(xf, axis=-1, keepdims=True)
    var = jnp.mean((xf - mean) ** 2, axis=-1, keepdims=True)
    xn = (xf - mean) * jax.lax.rsqrt(var + 1e-5) * ln_gamma + ln_beta
    h = xn @ w1 + b1
    a, g = h[..., :inner], h[..., inner:]
    u = a * jax.nn.sigmoid(g)
    pad = (kernel_size - 1) // 2
    u_pad = jnp.pad(u, ((0, 0), (pad, pad), (0, 0)))
    v = jnp.zeros_like(u)
    for k in range(kernel_size):
        v = v + u_pad[:, k:k + S, :] * dw[k]
    v = v + dw_b
    v = (v - bn_mean) * jax.lax.rsqrt(bn_var + 1e-5) * bn_gamma + bn_beta
    v = v * jax.nn.sigmoid(v)
    y = v @ w2 + b2
    return y.astype(x.dtype)


if __name__ == "__main__":
    # Small shapes consistent with the module: [batch, seq, dim], expansion_factor=2.
    B, S, D = 2, 8, 32
    expansion_factor = 2
    kernel_size = 31
    inner = D * expansion_factor

    key = jax.random.PRNGKey(0)
    ks = jax.random.split(key, 13)

    x = jax.random.normal(ks[0], (B, S, D), dtype=jnp.float32)
    ln_gamma = 1.0 + 0.1 * jax.random.normal(ks[1], (D,), dtype=jnp.float32)
    ln_beta = 0.1 * jax.random.normal(ks[2], (D,), dtype=jnp.float32)
    # PyTorch Conv2d weights are (out, in, 1, 1) / (C, 1, 1, K); we use the
    # transposed (in, out) / (K, C) layouts expected by the kernel.
    w1 = 0.05 * jax.random.normal(ks[3], (D, 2 * inner), dtype=jnp.float32)
    b1 = 0.05 * jax.random.normal(ks[4], (2 * inner,), dtype=jnp.float32)
    dw = 0.05 * jax.random.normal(ks[5], (kernel_size, inner), dtype=jnp.float32)
    dw_b = 0.05 * jax.random.normal(ks[6], (inner,), dtype=jnp.float32)
    bn_gamma = 1.0 + 0.1 * jax.random.normal(ks[7], (inner,), dtype=jnp.float32)
    bn_beta = 0.1 * jax.random.normal(ks[8], (inner,), dtype=jnp.float32)
    bn_mean = 0.1 * jax.random.normal(ks[9], (inner,), dtype=jnp.float32)
    bn_var = 0.5 + jax.random.uniform(ks[10], (inner,), dtype=jnp.float32)
    w2 = 0.05 * jax.random.normal(ks[11], (inner, D), dtype=jnp.float32)
    b2 = 0.05 * jax.random.normal(ks[12], (D,), dtype=jnp.float32)

    weights = (ln_gamma, ln_beta, w1, b1, dw, dw_b,
               bn_gamma, bn_beta, bn_mean, bn_var, w2, b2)

    # Test 1: single seq tile (S fits in one block).
    out = conformer_convolution(x, *weights, kernel_size=kernel_size)
    out = jax.block_until_ready(out)
    ref = _reference(x, *weights, kernel_size=kernel_size)
    assert out.shape == (B, S, D), out.shape
    # Kernel uses bf16 matmul operands (f32 accumulation) vs f32 reference.
    assert jnp.allclose(out, ref, atol=2e-2, rtol=2e-2), (
        float(jnp.max(jnp.abs(out - ref))))

    # Test 2: multiple seq tiles with halo + remainder masking (S=40, tile=16).
    S2 = 40
    x2 = jax.random.normal(jax.random.PRNGKey(1), (B, S2, D), dtype=jnp.float32)
    out2 = conformer_convolution(x2, *weights, kernel_size=kernel_size, seq_tile=16)
    out2 = jax.block_until_ready(out2)
    ref2 = _reference(x2, *weights, kernel_size=kernel_size)
    assert out2.shape == (B, S2, D), out2.shape
    assert jnp.allclose(out2, ref2, atol=2e-2, rtol=2e-2), (
        float(jnp.max(jnp.abs(out2 - ref2))))

    print("KERNEL_OK")
</pallas_src>

<mosaic_0001>
module attributes {stable_mosaic.version = 11 : i64} {
  func.func @_conformer_conv_kernel(%arg0: i32, %arg1: i32, %arg2: memref<2x40x128xf32, #tpu.memory_space<any>>, %arg3: memref<128x128xbf16, #tpu.memory_space<vmem>>, %arg4: memref<1x128xf32, #tpu.memory_space<vmem>>, %arg5: memref<128x128xbf16, #tpu.memory_space<vmem>>, %arg6: memref<1x128xf32, #tpu.memory_space<vmem>>, %arg7: memref<32x128xf32, #tpu.memory_space<vmem>>, %arg8: memref<1x128xf32, #tpu.memory_space<vmem>>, %arg9: memref<128x128xbf16, #tpu.memory_space<vmem>>, %arg10: memref<1x128xf32, #tpu.memory_space<vmem>>, %arg11: memref<1x8x128xf32, #tpu.memory_space<vmem>>, %arg12: memref<2x40x128xf32, #tpu.memory_space<vmem>>, %arg13: memref<2x!tpu.dma_semaphore, #tpu.memory_space<semaphore_mem>>, %arg14: memref<40x128xf32, #tpu.memory_space<vmem>>) attributes {dimension_semantics = [#tpu.dimension_semantics<parallel>, #tpu.dimension_semantics<arbitrary>], iteration_bounds = array<i64: 2, 1>, scalar_prefetch = 0 : i64, scratch_operands = 3 : i64, tpu.core_type = #tpu.core_type<tc>, window_params = [{}, {pipeline_mode = #tpu.pipeline_mode<synchronous>, transform_indices = @transform_1, window_bounds = array<i64: 128, 128>}, {pipeline_mode = #tpu.pipeline_mode<synchronous>, transform_indices = @transform_2, window_bounds = array<i64: 1, 128>}, {pipeline_mode = #tpu.pipeline_mode<synchronous>, transform_indices = @transform_3, window_bounds = array<i64: 128, 128>}, {pipeline_mode = #tpu.pipeline_mode<synchronous>, transform_indices = @transform_4, window_bounds = array<i64: 1, 128>}, {pipeline_mode = #tpu.pipeline_mode<synchronous>, transform_indices = @transform_5, window_bounds = array<i64: 32, 128>}, {pipeline_mode = #tpu.pipeline_mode<synchronous>, transform_indices = @transform_6, window_bounds = array<i64: 1, 128>}, {pipeline_mode = #tpu.pipeline_mode<synchronous>, transform_indices = @transform_7, window_bounds = array<i64: 128, 128>}, {pipeline_mode = #tpu.pipeline_mode<synchronous>, transform_indices = @transform_8, window_bounds = array<i64: 1, 128>}, {transform_indices = @transform_9, window_bounds = array<i64: 1, 8, 128>}]} {
    %c2_i32 = arith.constant 2 : i32
    %0 = arith.remsi %arg1, %c2_i32 : i32
    %c0_i32 = arith.constant 0 : i32
    %1 = arith.cmpi eq, %arg1, %c0_i32 : i32
    %2 = arith.extui %1 : i1 to i32
    %c0_i32_0 = arith.constant 0 : i32
    %3 = arith.cmpi ne, %2, %c0_i32_0 : i32
    scf.if %3 {
      %c0_i32_135 = arith.constant 0 : i32
      %246 = tpu.assume_multiple %c0_i32_135, 8 : i32
      %c0_i32_136 = arith.constant 0 : i32
      %c0_i32_137 = arith.constant 0 : i32
      %c0_i32_138 = arith.constant 0 : i32
      %247 = tpu.memref_slice %arg2[%arg0, %246, %c0_i32_138] : memref<2x40x128xf32, #tpu.memory_space<any>> -> memref<1x40x128xf32, #tpu.memory_space<any>>
      %248 = tpu.memref_squeeze %247 : memref<1x40x128xf32, #tpu.memory_space<any>> -> memref<40x128xf32, #tpu.memory_space<any>>
      %c0_i32_139 = arith.constant 0 : i32
      %c0_i32_140 = arith.constant 0 : i32
      %249 = tpu.memref_slice %arg12[%c0_i32_136, %c0_i32_139, %c0_i32_140] : memref<2x40x128xf32, #tpu.memory_space<vmem>> -> memref<1x40x128xf32, #tpu.memory_space<vmem>>
      %250 = tpu.memref_squeeze %249 : memref<1x40x128xf32, #tpu.memory_space<vmem>> -> memref<40x128xf32, #tpu.memory_space<vmem>>
      %251 = tpu.memref_slice %arg13[%c0_i32_137] : memref<2x!tpu.dma_semaphore, #tpu.memory_space<semaphore_mem>> -> memref<1x!tpu.dma_semaphore, #tpu.memory_space<semaphore_mem>>
      %252 = tpu.memref_squeeze %251 : memref<1x!tpu.dma_semaphore, #tpu.memory_space<semaphore_mem>> -> memref<!tpu.dma_semaphore, #tpu.memory_space<semaphore_mem>>
      tpu.enqueue_dma source(%248 : memref<40x128xf32, #tpu.memory_space<any>>) target(%250 : memref<40x128xf32, #tpu.memory_space<vmem>>) target_semaphore(%252 : memref<!tpu.dma_semaphore, #tpu.memory_space<semaphore_mem>>)
    } else {
    }
    %c8_i32 = arith.constant 8 : i32
    %4 = arith.muli %arg1, %c8_i32 : i32
    %5 = tpu.assume_multiple %4, 8 : i32
    %c0_i32_1 = arith.constant 0 : i32
    %6 = tpu.memref_slice %arg2[%arg0, %5, %c0_i32_1] : memref<2x40x128xf32, #tpu.memory_space<any>> -> memref<1x40x128xf32, #tpu.memory_space<any>>
    %7 = tpu.memref_squeeze %6 : memref<1x40x128xf32, #tpu.memory_space<any>> -> memref<40x128xf32, #tpu.memory_space<any>>
    %c0_i32_2 = arith.constant 0 : i32
    %c0_i32_3 = arith.constant 0 : i32
    %8 = tpu.memref_slice %arg12[%0, %c0_i32_2, %c0_i32_3] : memref<2x40x128xf32, #tpu.memory_space<vmem>> -> memref<1x40x128xf32, #tpu.memory_space<vmem>>
    %9 = tpu.memref_squeeze %8 : memref<1x40x128xf32, #tpu.memory_space<vmem>> -> memref<40x128xf32, #tpu.memory_space<vmem>>
    %10 = tpu.memref_slice %arg13[%0] : memref<2x!tpu.dma_semaphore, #tpu.memory_space<semaphore_mem>> -> memref<1x!tpu.dma_semaphore, #tpu.memory_space<semaphore_mem>>
    %11 = tpu.memref_squeeze %10 : memref<1x!tpu.dma_semaphore, #tpu.memory_space<semaphore_mem>> -> memref<!tpu.dma_semaphore, #tpu.memory_space<semaphore_mem>>
    tpu.wait_dma2 semaphore(%11 : memref<!tpu.dma_semaphore, #tpu.memory_space<semaphore_mem>>) src(%7 : memref<40x128xf32, #tpu.memory_space<any>>) dst(%9 : memref<40x128xf32, #tpu.memory_space<vmem>>)
    %c1_i32 = arith.constant 1 : i32
    %12 = arith.addi %arg1, %c1_i32 : i32
    %c1_i32_4 = arith.constant 1 : i32
    %13 = arith.cmpi slt, %12, %c1_i32_4 : i32
    %14 = arith.extui %13 : i1 to i32
    %c0_i32_5 = arith.constant 0 : i32
    %15 = arith.cmpi ne, %14, %c0_i32_5 : i32
    scf.if %15 {
      %c1_i32_135 = arith.constant 1 : i32
      %246 = arith.addi %arg1, %c1_i32_135 : i32
      %c8_i32_136 = arith.constant 8 : i32
      %247 = arith.muli %246, %c8_i32_136 : i32
      %248 = tpu.assume_multiple %247, 8 : i32
      %c1_i32_137 = arith.constant 1 : i32
      %249 = arith.subi %c1_i32_137, %0 : i32
      %c1_i32_138 = arith.constant 1 : i32
      %250 = arith.subi %c1_i32_138, %0 : i32
      %c0_i32_139 = arith.constant 0 : i32
      %251 = tpu.memref_slice %arg2[%arg0, %248, %c0_i32_139] : memref<2x40x128xf32, #tpu.memory_space<any>> -> memref<1x40x128xf32, #tpu.memory_space<any>>
      %252 = tpu.memref_squeeze %251 : memref<1x40x128xf32, #tpu.memory_space<any>> -> memref<40x128xf32, #tpu.memory_space<any>>
      %c0_i32_140 = arith.constant 0 : i32
      %c0_i32_141 = arith.constant 0 : i32
      %253 = tpu.memref_slice %arg12[%249, %c0_i32_140, %c0_i32_141] : memref<2x40x128xf32, #tpu.memory_space<vmem>> -> memref<1x40x128xf32, #tpu.memory_space<vmem>>
      %254 = tpu.memref_squeeze %253 : memref<1x40x128xf32, #tpu.memory_space<vmem>> -> memref<40x128xf32, #tpu.memory_space<vmem>>
      %255 = tpu.memref_slice %arg13[%250] : memref<2x!tpu.dma_semaphore, #tpu.memory_space<semaphore_mem>> -> memref<1x!tpu.dma_semaphore, #tpu.memory_space<semaphore_mem>>
      %256 = tpu.memref_squeeze %255 : memref<1x!tpu.dma_semaphore, #tpu.memory_space<semaphore_mem>> -> memref<!tpu.dma_semaphore, #tpu.memory_space<semaphore_mem>>
      tpu.enqueue_dma source(%252 : memref<40x128xf32, #tpu.memory_space<any>>) target(%254 : memref<40x128xf32, #tpu.memory_space<vmem>>) target_semaphore(%256 : memref<!tpu.dma_semaphore, #tpu.memory_space<semaphore_mem>>)
    } else {
    }
    %16 = arith.index_cast %0 : i32 to index
    %c0 = arith.constant 0 : index
    %c0_6 = arith.constant 0 : index
    %17 = vector.load %arg12[%16, %c0, %c0_6] : memref<2x40x128xf32, #tpu.memory_space<vmem>>, vector<1x40x128xf32>
    %18 = vector.shape_cast %17 : vector<1x40x128xf32> to vector<40x128xf32>
    %cst = arith.constant dense<0.000000e+00> : vector<40xf32>
    %19 = vector.multi_reduction <add>, %18, %cst [1] : vector<40x128xf32> to vector<40xf32>
    %20 = vector.shape_cast %19 : vector<40xf32> to vector<40x1xf32>
    %cst_7 = arith.constant 3.125000e-02 : f32
    %21 = vector.broadcast %cst_7 : f32 to vector<40x1xf32>
    %22 = arith.mulf %20, %21 : vector<40x1xf32>
    %23 = vector.broadcast %22 : vector<40x1xf32> to vector<40x128xf32>
    %24 = arith.subf %18, %23 : vector<40x128xf32>
    %25 = arith.mulf %24, %24 : vector<40x128xf32>
    %cst_8 = arith.constant dense<0.000000e+00> : vector<40xf32>
    %26 = vector.multi_reduction <add>, %25, %cst_8 [1] : vector<40x128xf32> to vector<40xf32>
    %27 = vector.shape_cast %26 : vector<40xf32> to vector<40x1xf32>
    %28 = arith.mulf %22, %22 : vector<40x1xf32>
    %cst_9 = arith.constant 9.600000e+01 : f32
    %29 = vector.broadcast %cst_9 : f32 to vector<40x1xf32>
    %30 = arith.mulf %29, %28 : vector<40x1xf32>
    %31 = arith.subf %27, %30 : vector<40x1xf32>
    %cst_10 = arith.constant 3.125000e-02 : f32
    %32 = vector.broadcast %cst_10 : f32 to vector<40x1xf32>
    %33 = arith.mulf %31, %32 : vector<40x1xf32>
    %cst_11 = arith.constant 0.000000e+00 : f32
    %34 = vector.broadcast %cst_11 : f32 to vector<40x1xf32>
    %35 = arith.maximumf %33, %34 : vector<40x1xf32>
    %cst_12 = arith.constant 9.99999974E-6 : f32
    %36 = vector.broadcast %cst_12 : f32 to vector<40x1xf32>
    %37 = arith.addf %35, %36 : vector<40x1xf32>
    %38 = math.rsqrt %37 : vector<40x1xf32>
    %39 = vector.broadcast %38 : vector<40x1xf32> to vector<40x128xf32>
    %40 = arith.mulf %24, %39 : vector<40x128xf32>
    %41 = arith.truncf %40 : vector<40x128xf32> to vector<40x128xbf16>
    %c0_13 = arith.constant 0 : index
    %c0_14 = arith.constant 0 : index
    %42 = vector.load %arg3[%c0_13, %c0_14] : memref<128x128xbf16, #tpu.memory_space<vmem>>, vector<128x128xbf16>
    %cst_15 = arith.constant dense<0.000000e+00> : vector<40x128xf32>
    %43 = tpu.matmul %41, %42, %cst_15 {dimension_numbers = #tpu.dot_dimension_numbers<[1], [0], [0], [1], [0, 0, 1, 1], [], []>} : vector<40x128xbf16>, vector<128x128xbf16>, vector<40x128xf32> -> vector<40x128xf32>
    %c0_16 = arith.constant 0 : index
    %c0_17 = arith.constant 0 : index
    %44 = vector.load %arg4[%c0_16, %c0_17] : memref<1x128xf32, #tpu.memory_space<vmem>>, vector<1x128xf32>
    %45 = vector.broadcast %44 : vector<1x128xf32> to vector<40x128xf32>
    %46 = arith.addf %43, %45 : vector<40x128xf32>
    %c0_18 = arith.constant 0 : index
    %c0_19 = arith.constant 0 : index
    %47 = vector.load %arg5[%c0_18, %c0_19] : memref<128x128xbf16, #tpu.memory_space<vmem>>, vector<128x128xbf16>
    %cst_20 = arith.constant dense<0.000000e+00> : vector<40x128xf32>
    %48 = tpu.matmul %41, %47, %cst_20 {dimension_numbers = #tpu.dot_dimension_numbers<[1], [0], [0], [1], [0, 0, 1, 1], [], []>} : vector<40x128xbf16>, vector<128x128xbf16>, vector<40x128xf32> -> vector<40x128xf32>
    %c0_21 = arith.constant 0 : index
    %c0_22 = arith.constant 0 : index
    %49 = vector.load %arg6[%c0_21, %c0_22] : memref<1x128xf32, #tpu.memory_space<vmem>>, vector<1x128xf32>
    %50 = vector.broadcast %49 : vector<1x128xf32> to vector<40x128xf32>
    %51 = arith.addf %48, %50 : vector<40x128xf32>
    %52 = arith.negf %51 : vector<40x128xf32>
    %53 = math.exp %52 : vector<40x128xf32>
    %cst_23 = arith.constant 1.000000e+00 : f32
    %54 = vector.broadcast %cst_23 : f32 to vector<40x128xf32>
    %55 = arith.addf %54, %53 : vector<40x128xf32>
    %56 = arith.divf %54, %55 : vector<40x128xf32>
    %57 = arith.mulf %46, %56 : vector<40x128xf32>
    %c8_i32_24 = arith.constant 8 : i32
    %58 = arith.muli %arg1, %c8_i32_24 : i32
    %59 = tpu.iota {dimensions = array<i32: 0>} : vector<40x1xi32>
    %60 = vector.broadcast %58 : i32 to vector<40x1xi32>
    %61 = arith.addi %60, %59 : vector<40x1xi32>
    %c15_i32 = arith.constant 15 : i32
    %62 = vector.broadcast %c15_i32 : i32 to vector<40x1xi32>
    %63 = arith.subi %61, %62 : vector<40x1xi32>
    %c0_i32_25 = arith.constant 0 : i32
    %64 = vector.broadcast %c0_i32_25 : i32 to vector<40x1xi32>
    %65 = arith.cmpi sge, %63, %64 : vector<40x1xi32>
    %c8_i32_26 = arith.constant 8 : i32
    %66 = vector.broadcast %c8_i32_26 : i32 to vector<40x1xi32>
    %67 = arith.cmpi slt, %63, %66 : vector<40x1xi32>
    %68 = arith.andi %65, %67 : vector<40x1xi1>
    %cst_27 = arith.constant 0.000000e+00 : f32
    %69 = vector.shape_cast %68 : vector<40x1xi1> to vector<40x1xi1>
    %70 = vector.broadcast %69 : vector<40x1xi1> to vector<40x128xi1>
    %71 = vector.broadcast %cst_27 : f32 to vector<40x128xf32>
    %72 = arith.select %70, %57, %71 : vector<40x128xi1>, vector<40x128xf32>
    %c0_28 = arith.constant 0 : index
    %c0_29 = arith.constant 0 : index
    %73 = vector.load %arg14[%c0_28, %c0_29] : memref<40x128xf32, #tpu.memory_space<vmem>>, vector<40x128xf32>
    tpu.vector_store %arg14[%c0_28, %c0_29], %72 {strides = array<i32>} : memref<40x128xf32, #tpu.memory_space<vmem>>, vector<40x128xf32>,
    %c0_30 = arith.constant 0 : index
    %c0_31 = arith.constant 0 : index
    %74 = vector.load %arg14[%c0_30, %c0_31] : memref<40x128xf32, #tpu.memory_space<vmem>>, vector<8x128xf32>
    %c0_32 = arith.constant 0 : index
    %c0_33 = arith.constant 0 : index
    %75 = vector.load %arg7[%c0_32, %c0_33] : memref<32x128xf32, #tpu.memory_space<vmem>>, vector<1x128xf32>
    %76 = vector.broadcast %75 : vector<1x128xf32> to vector<8x128xf32>
    %77 = arith.mulf %74, %76 : vector<8x128xf32>
    %c1 = arith.constant 1 : index
    %c0_34 = arith.constant 0 : index
    %78 = vector.load %arg14[%c1, %c0_34] : memref<40x128xf32, #tpu.memory_space<vmem>>, vector<8x128xf32>
    %c1_35 = arith.constant 1 : index
    %c0_36 = arith.constant 0 : index
    %79 = vector.load %arg7[%c1_35, %c0_36] : memref<32x128xf32, #tpu.memory_space<vmem>>, vector<1x128xf32>
    %80 = vector.broadcast %79 : vector<1x128xf32> to vector<8x128xf32>
    %81 = arith.mulf %78, %80 : vector<8x128xf32>
    %82 = arith.addf %77, %81 : vector<8x128xf32>
    %c2 = arith.constant 2 : index
    %c0_37 = arith.constant 0 : index
    %83 = vector.load %arg14[%c2, %c0_37] : memref<40x128xf32, #tpu.memory_space<vmem>>, vector<8x128xf32>
    %c2_38 = arith.constant 2 : index
    %c0_39 = arith.constant 0 : index
    %84 = vector.load %arg7[%c2_38, %c0_39] : memref<32x128xf32, #tpu.memory_space<vmem>>, vector<1x128xf32>
    %85 = vector.broadcast %84 : vector<1x128xf32> to vector<8x128xf32>
    %86 = arith.mulf %83, %85 : vector<8x128xf32>
    %87 = arith.addf %82, %86 : vector<8x128xf32>
    %c3 = arith.constant 3 : index
    %c0_40 = arith.constant 0 : index
    %88 = vector.load %arg14[%c3, %c0_40] : memref<40x128xf32, #tpu.memory_space<vmem>>, vector<8x128xf32>
    %c3_41 = arith.constant 3 : index
    %c0_42 = arith.constant 0 : index
    %89 = vector.load %arg7[%c3_41, %c0_42] : memref<32x128xf32, #tpu.memory_space<vmem>>, vector<1x128xf32>
    %90 = vector.broadcast %89 : vector<1x128xf32> to vector<8x128xf32>
    %91 = arith.mulf %88, %90 : vector<8x128xf32>
    %92 = arith.addf %87, %91 : vector<8x128xf32>
    %c4 = arith.constant 4 : index
    %c0_43 = arith.constant 0 : index
    %93 = vector.load %arg14[%c4, %c0_43] : memref<40x128xf32, #tpu.memory_space<vmem>>, vector<8x128xf32>
    %c4_44 = arith.constant 4 : index
    %c0_45 = arith.constant 0 : index
    %94 = vector.load %arg7[%c4_44, %c0_45] : memref<32x128xf32, #tpu.memory_space<vmem>>, vector<1x128xf32>
    %95 = vector.broadcast %94 : vector<1x128xf32> to vector<8x128xf32>
    %96 = arith.mulf %93, %95 : vector<8x128xf32>
    %97 = arith.addf %92, %96 : vector<8x128xf32>
    %c5 = arith.constant 5 : index
    %c0_46 = arith.constant 0 : index
    %98 = vector.load %arg14[%c5, %c0_46] : memref<40x128xf32, #tpu.memory_space<vmem>>, vector<8x128xf32>
    %c5_47 = arith.constant 5 : index
    %c0_48 = arith.constant 0 : index
    %99 = vector.load %arg7[%c5_47, %c0_48] : memref<32x128xf32, #tpu.memory_space<vmem>>, vector<1x128xf32>
    %100 = vector.broadcast %99 : vector<1x128xf32> to vector<8x128xf32>
    %101 = arith.mulf %98, %100 : vector<8x128xf32>
    %102 = arith.addf %97, %101 : vector<8x128xf32>
    %c6 = arith.constant 6 : index
    %c0_49 = arith.constant 0 : index
    %103 = vector.load %arg14[%c6, %c0_49] : memref<40x128xf32, #tpu.memory_space<vmem>>, vector<8x128xf32>
    %c6_50 = arith.constant 6 : index
    %c0_51 = arith.constant 0 : index
    %104 = vector.load %arg7[%c6_50, %c0_51] : memref<32x128xf32, #tpu.memory_space<vmem>>, vector<1x128xf32>
    %105 = vector.broadcast %104 : vector<1x128xf32> to vector<8x128xf32>
    %106 = arith.mulf %103, %105 : vector<8x128xf32>
    %107 = arith.addf %102, %106 : vector<8x128xf32>
    %c7 = arith.constant 7 : index
    %c0_52 = arith.constant 0 : index
    %108 = vector.load %arg14[%c7, %c0_52] : memref<40x128xf32, #tpu.memory_space<vmem>>, vector<8x128xf32>
    %c7_53 = arith.constant 7 : index
    %c0_54 = arith.constant 0 : index
    %109 = vector.load %arg7[%c7_53, %c0_54] : memref<32x128xf32, #tpu.memory_space<vmem>>, vector<1x128xf32>
    %110 = vector.broadcast %109 : vector<1x128xf32> to vector<8x128xf32>
    %111 = arith.mulf %108, %110 : vector<8x128xf32>
    %112 = arith.addf %107, %111 : vector<8x128xf32>
    %c8 = arith.constant 8 : index
    %c0_55 = arith.constant 0 : index
    %113 = vector.load %arg14[%c8, %c0_55] : memref<40x128xf32, #tpu.memory_space<vmem>>, vector<8x128xf32>
    %c8_56 = arith.constant 8 : index
    %c0_57 = arith.constant 0 : index
    %114 = vector.load %arg7[%c8_56, %c0_57] : memref<32x128xf32, #tpu.memory_space<vmem>>, vector<1x128xf32>
    %115 = vector.broadcast %114 : vector<1x128xf32> to vector<8x128xf32>
    %116 = arith.mulf %113, %115 : vector<8x128xf32>
    %117 = arith.addf %112, %116 : vector<8x128xf32>
    %c9 = arith.constant 9 : index
    %c0_58 = arith.constant 0 : index
    %118 = vector.load %arg14[%c9, %c0_58] : memref<40x128xf32, #tpu.memory_space<vmem>>, vector<8x128xf32>
    %c9_59 = arith.constant 9 : index
    %c0_60 = arith.constant 0 : index
    %119 = vector.load %arg7[%c9_59, %c0_60] : memref<32x128xf32, #tpu.memory_space<vmem>>, vector<1x128xf32>
    %120 = vector.broadcast %119 : vector<1x128xf32> to vector<8x128xf32>
    %121 = arith.mulf %118, %120 : vector<8x128xf32>
    %122 = arith.addf %117, %121 : vector<8x128xf32>
    %c10 = arith.constant 10 : index
    %c0_61 = arith.constant 0 : index
    %123 = vector.load %arg14[%c10, %c0_61] : memref<40x128xf32, #tpu.memory_space<vmem>>, vector<8x128xf32>
    %c10_62 = arith.constant 10 : index
    %c0_63 = arith.constant 0 : index
    %124 = vector.load %arg7[%c10_62, %c0_63] : memref<32x128xf32, #tpu.memory_space<vmem>>, vector<1x128xf32>
    %125 = vector.broadcast %124 : vector<1x128xf32> to vector<8x128xf32>
    %126 = arith.mulf %123, %125 : vector<8x128xf32>
    %127 = arith.addf %122, %126 : vector<8x128xf32>
    %c11 = arith.constant 11 : index
    %c0_64 = arith.constant 0 : index
    %128 = vector.load %arg14[%c11, %c0_64] : memref<40x128xf32, #tpu.memory_space<vmem>>, vector<8x128xf32>
    %c11_65 = arith.constant 11 : index
    %c0_66 = arith.constant 0 : index
    %129 = vector.load %arg7[%c11_65, %c0_66] : memref<32x128xf32, #tpu.memory_space<vmem>>, vector<1x128xf32>
    %130 = vector.broadcast %129 : vector<1x128xf32> to vector<8x128xf32>
    %131 = arith.mulf %128, %130 : vector<8x128xf32>
    %132 = arith.addf %127, %131 : vector<8x128xf32>
    %c12 = arith.constant 12 : index
    %c0_67 = arith.constant 0 : index
    %133 = vector.load %arg14[%c12, %c0_67] : memref<40x128xf32, #tpu.memory_space<vmem>>, vector<8x128xf32>
    %c12_68 = arith.constant 12 : index
    %c0_69 = arith.constant 0 : index
    %134 = vector.load %arg7[%c12_68, %c0_69] : memref<32x128xf32, #tpu.memory_space<vmem>>, vector<1x128xf32>
    %135 = vector.broadcast %134 : vector<1x128xf32> to vector<8x128xf32>
    %136 = arith.mulf %133, %135 : vector<8x128xf32>
    %137 = arith.addf %132, %136 : vector<8x128xf32>
    %c13 = arith.constant 13 : index
    %c0_70 = arith.constant 0 : index
    %138 = vector.load %arg14[%c13, %c0_70] : memref<40x128xf32, #tpu.memory_space<vmem>>, vector<8x128xf32>
    %c13_71 = arith.constant 13 : index
    %c0_72 = arith.constant 0 : index
    %139 = vector.load %arg7[%c13_71, %c0_72] : memref<32x128xf32, #tpu.memory_space<vmem>>, vector<1x128xf32>
    %140 = vector.broadcast %139 : vector<1x128xf32> to vector<8x128xf32>
    %141 = arith.mulf %138, %140 : vector<8x128xf32>
    %142 = arith.addf %137, %141 : vector<8x128xf32>
    %c14 = arith.constant 14 : index
    %c0_73 = arith.constant 0 : index
    %143 = vector.load %arg14[%c14, %c0_73] : memref<40x128xf32, #tpu.memory_space<vmem>>, vector<8x128xf32>
    %c14_74 = arith.constant 14 : index
    %c0_75 = arith.constant 0 : index
    %144 = vector.load %arg7[%c14_74, %c0_75] : memref<32x128xf32, #tpu.memory_space<vmem>>, vector<1x128xf32>
    %145 = vector.broadcast %144 : vector<1x128xf32> to vector<8x128xf32>
    %146 = arith.mulf %143, %145 : vector<8x128xf32>
    %147 = arith.addf %142, %146 : vector<8x128xf32>
    %c15 = arith.constant 15 : index
    %c0_76 = arith.constant 0 : index
    %148 = vector.load %arg14[%c15, %c0_76] : memref<40x128xf32, #tpu.memory_space<vmem>>, vector<8x128xf32>
    %c15_77 = arith.constant 15 : index
    %c0_78 = arith.constant 0 : index
    %149 = vector.load %arg7[%c15_77, %c0_78] : memref<32x128xf32, #tpu.memory_space<vmem>>, vector<1x128xf32>
    %150 = vector.broadcast %149 : vector<1x128xf32> to vector<8x128xf32>
    %151 = arith.mulf %148, %150 : vector<8x128xf32>
    %152 = arith.addf %147, %151 : vector<8x128xf32>
    %c16 = arith.constant 16 : index
    %c0_79 = arith.constant 0 : index
    %153 = vector.load %arg14[%c16, %c0_79] : memref<40x128xf32, #tpu.memory_space<vmem>>, vector<8x128xf32>
    %c16_80 = arith.constant 16 : index
    %c0_81 = arith.constant 0 : index
    %154 = vector.load %arg7[%c16_80, %c0_81] : memref<32x128xf32, #tpu.memory_space<vmem>>, vector<1x128xf32>
    %155 = vector.broadcast %154 : vector<1x128xf32> to vector<8x128xf32>
    %156 = arith.mulf %153, %155 : vector<8x128xf32>
    %157 = arith.addf %152, %156 : vector<8x128xf32>
    %c17 = arith.constant 17 : index
    %c0_82 = arith.constant 0 : index
    %158 = vector.load %arg14[%c17, %c0_82] : memref<40x128xf32, #tpu.memory_space<vmem>>, vector<8x128xf32>
    %c17_83 = arith.constant 17 : index
    %c0_84 = arith.constant 0 : index
    %159 = vector.load %arg7[%c17_83, %c0_84] : memref<32x128xf32, #tpu.memory_space<vmem>>, vector<1x128xf32>
    %160 = vector.broadcast %159 : vector<1x128xf32> to vector<8x128xf32>
    %161 = arith.mulf %158, %160 : vector<8x128xf32>
    %162 = arith.addf %157, %161 : vector<8x128xf32>
    %c18 = arith.constant 18 : index
    %c0_85 = arith.constant 0 : index
    %163 = vector.load %arg14[%c18, %c0_85] : memref<40x128xf32, #tpu.memory_space<vmem>>, vector<8x128xf32>
    %c18_86 = arith.constant 18 : index
    %c0_87 = arith.constant 0 : index
    %164 = vector.load %arg7[%c18_86, %c0_87] : memref<32x128xf32, #tpu.memory_space<vmem>>, vector<1x128xf32>
    %165 = vector.broadcast %164 : vector<1x128xf32> to vector<8x128xf32>
    %166 = arith.mulf %163, %165 : vector<8x128xf32>
    %167 = arith.addf %162, %166 : vector<8x128xf32>
    %c19 = arith.constant 19 : index
    %c0_88 = arith.constant 0 : index
    %168 = vector.load %arg14[%c19, %c0_88] : memref<40x128xf32, #tpu.memory_space<vmem>>, vector<8x128xf32>
    %c19_89 = arith.constant 19 : index
    %c0_90 = arith.constant 0 : index
    %169 = vector.load %arg7[%c19_89, %c0_90] : memref<32x128xf32, #tpu.memory_space<vmem>>, vector<1x128xf32>
    %170 = vector.broadcast %169 : vector<1x128xf32> to vector<8x128xf32>
    %171 = arith.mulf %168, %170 : vector<8x128xf32>
    %172 = arith.addf %167, %171 : vector<8x128xf32>
    %c20 = arith.constant 20 : index
    %c0_91 = arith.constant 0 : index
    %173 = vector.load %arg14[%c20, %c0_91] : memref<40x128xf32, #tpu.memory_space<vmem>>, vector<8x128xf32>
    %c20_92 = arith.constant 20 : index
    %c0_93 = arith.constant 0 : index
    %174 = vector.load %arg7[%c20_92, %c0_93] : memref<32x128xf32, #tpu.memory_space<vmem>>, vector<1x128xf32>
    %175 = vector.broadcast %174 : vector<1x128xf32> to vector<8x128xf32>
    %176 = arith.mulf %173, %175 : vector<8x128xf32>
    %177 = arith.addf %172, %176 : vector<8x128xf32>
    %c21 = arith.constant 21 : index
    %c0_94 = arith.constant 0 : index
    %178 = vector.load %arg14[%c21, %c0_94] : memref<40x128xf32, #tpu.memory_space<vmem>>, vector<8x128xf32>
    %c21_95 = arith.constant 21 : index
    %c0_96 = arith.constant 0 : index
    %179 = vector.load %arg7[%c21_95, %c0_96] : memref<32x128xf32, #tpu.memory_space<vmem>>, vector<1x128xf32>
    %180 = vector.broadcast %179 : vector<1x128xf32> to vector<8x128xf32>
    %181 = arith.mulf %178, %180 : vector<8x128xf32>
    %182 = arith.addf %177, %181 : vector<8x128xf32>
    %c22 = arith.constant 22 : index
    %c0_97 = arith.constant 0 : index
    %183 = vector.load %arg14[%c22, %c0_97] : memref<40x128xf32, #tpu.memory_space<vmem>>, vector<8x128xf32>
    %c22_98 = arith.constant 22 : index
    %c0_99 = arith.constant 0 : index
    %184 = vector.load %arg7[%c22_98, %c0_99] : memref<32x128xf32, #tpu.memory_space<vmem>>, vector<1x128xf32>
    %185 = vector.broadcast %184 : vector<1x128xf32> to vector<8x128xf32>
    %186 = arith.mulf %183, %185 : vector<8x128xf32>
    %187 = arith.addf %182, %186 : vector<8x128xf32>
    %c23 = arith.constant 23 : index
    %c0_100 = arith.constant 0 : index
    %188 = vector.load %arg14[%c23, %c0_100] : memref<40x128xf32, #tpu.memory_space<vmem>>, vector<8x128xf32>
    %c23_101 = arith.constant 23 : index
    %c0_102 = arith.constant 0 : index
    %189 = vector.load %arg7[%c23_101, %c0_102] : memref<32x128xf32, #tpu.memory_space<vmem>>, vector<1x128xf32>
    %190 = vector.broadcast %189 : vector<1x128xf32> to vector<8x128xf32>
    %191 = arith.mulf %188, %190 : vector<8x128xf32>
    %192 = arith.addf %187, %191 : vector<8x128xf32>
    %c24 = arith.constant 24 : index
    %c0_103 = arith.constant 0 : index
    %193 = vector.load %arg14[%c24, %c0_103] : memref<40x128xf32, #tpu.memory_space<vmem>>, vector<8x128xf32>
    %c24_104 = arith.constant 24 : index
    %c0_105 = arith.constant 0 : index
    %194 = vector.load %arg7[%c24_104, %c0_105] : memref<32x128xf32, #tpu.memory_space<vmem>>, vector<1x128xf32>
    %195 = vector.broadcast %194 : vector<1x128xf32> to vector<8x128xf32>
    %196 = arith.mulf %193, %195 : vector<8x128xf32>
    %197 = arith.addf %192, %196 : vector<8x128xf32>
    %c25 = arith.constant 25 : index
    %c0_106 = arith.constant 0 : index
    %198 = vector.load %arg14[%c25, %c0_106] : memref<40x128xf32, #tpu.memory_space<vmem>>, vector<8x128xf32>
    %c25_107 = arith.constant 25 : index
    %c0_108 = arith.constant 0 : index
    %199 = vector.load %arg7[%c25_107, %c0_108] : memref<32x128xf32, #tpu.memory_space<vmem>>, vector<1x128xf32>
    %200 = vector.broadcast %199 : vector<1x128xf32> to vector<8x128xf32>
    %201 = arith.mulf %198, %200 : vector<8x128xf32>
    %202 = arith.addf %197, %201 : vector<8x128xf32>
    %c26 = arith.constant 26 : index
    %c0_109 = arith.constant 0 : index
    %203 = vector.load %arg14[%c26, %c0_109] : memref<40x128xf32, #tpu.memory_space<vmem>>, vector<8x128xf32>
    %c26_110 = arith.constant 26 : index
    %c0_111 = arith.constant 0 : index
    %204 = vector.load %arg7[%c26_110, %c0_111] : memref<32x128xf32, #tpu.memory_space<vmem>>, vector<1x128xf32>
    %205 = vector.broadcast %204 : vector<1x128xf32> to vector<8x128xf32>
    %206 = arith.mulf %203, %205 : vector<8x128xf32>
    %207 = arith.addf %202, %206 : vector<8x128xf32>
    %c27 = arith.constant 27 : index
    %c0_112 = arith.constant 0 : index
    %208 = vector.load %arg14[%c27, %c0_112] : memref<40x128xf32, #tpu.memory_space<vmem>>, vector<8x128xf32>
    %c27_113 = arith.constant 27 : index
    %c0_114 = arith.constant 0 : index
    %209 = vector.load %arg7[%c27_113, %c0_114] : memref<32x128xf32, #tpu.memory_space<vmem>>, vector<1x128xf32>
    %210 = vector.broadcast %209 : vector<1x128xf32> to vector<8x128xf32>
    %211 = arith.mulf %208, %210 : vector<8x128xf32>
    %212 = arith.addf %207, %211 : vector<8x128xf32>
    %c28 = arith.constant 28 : index
    %c0_115 = arith.constant 0 : index
    %213 = vector.load %arg14[%c28, %c0_115] : memref<40x128xf32, #tpu.memory_space<vmem>>, vector<8x128xf32>
    %c28_116 = arith.constant 28 : index
    %c0_117 = arith.constant 0 : index
    %214 = vector.load %arg7[%c28_116, %c0_117] : memref<32x128xf32, #tpu.memory_space<vmem>>, vector<1x128xf32>
    %215 = vector.broadcast %214 : vector<1x128xf32> to vector<8x128xf32>
    %216 = arith.mulf %213, %215 : vector<8x128xf32>
    %217 = arith.addf %212, %216 : vector<8x128xf32>
    %c29 = arith.constant 29 : index
    %c0_118 = arith.constant 0 : index
    %218 = vector.load %arg14[%c29, %c0_118] : memref<40x128xf32, #tpu.memory_space<vmem>>, vector<8x128xf32>
    %c29_119 = arith.constant 29 : index
    %c0_120 = arith.constant 0 : index
    %219 = vector.load %arg7[%c29_119, %c0_120] : memref<32x128xf32, #tpu.memory_space<vmem>>, vector<1x128xf32>
    %220 = vector.broadcast %219 : vector<1x128xf32> to vector<8x128xf32>
    %221 = arith.mulf %218, %220 : vector<8x128xf32>
    %222 = arith.addf %217, %221 : vector<8x128xf32>
    %c30 = arith.constant 30 : index
    %c0_121 = arith.constant 0 : index
    %223 = vector.load %arg14[%c30, %c0_121] : memref<40x128xf32, #tpu.memory_space<vmem>>, vector<8x128xf32>
    %c30_122 = arith.constant 30 : index
    %c0_123 = arith.constant 0 : index
    %224 = vector.load %arg7[%c30_122, %c0_123] : memref<32x128xf32, #tpu.memory_space<vmem>>, vector<1x128xf32>
    %225 = vector.broadcast %224 : vector<1x128xf32> to vector<8x128xf32>
    %226 = arith.mulf %223, %225 : vector<8x128xf32>
    %227 = arith.addf %222, %226 : vector<8x128xf32>
    %c0_124 = arith.constant 0 : index
    %c0_125 = arith.constant 0 : index
    %228 = vector.load %arg8[%c0_124, %c0_125] : memref<1x128xf32, #tpu.memory_space<vmem>>, vector<1x128xf32>
    %229 = vector.broadcast %228 : vector<1x128xf32> to vector<8x128xf32>
    %230 = arith.addf %227, %229 : vector<8x128xf32>
    %231 = arith.negf %230 : vector<8x128xf32>
    %232 = math.exp %231 : vector<8x128xf32>
    %cst_126 = arith.constant 1.000000e+00 : f32
    %233 = vector.broadcast %cst_126 : f32 to vector<8x128xf32>
    %234 = arith.addf %233, %232 : vector<8x128xf32>
    %235 = arith.divf %233, %234 : vector<8x128xf32>
    %236 = arith.mulf %230, %235 : vector<8x128xf32>
    %237 = arith.truncf %236 : vector<8x128xf32> to vector<8x128xbf16>
    %c0_127 = arith.constant 0 : index
    %c0_128 = arith.constant 0 : index
    %238 = vector.load %arg9[%c0_127, %c0_128] : memref<128x128xbf16, #tpu.memory_space<vmem>>, vector<128x128xbf16>
    %cst_129 = arith.constant dense<0.000000e+00> : vector<8x128xf32>
    %239 = tpu.matmul %237, %238, %cst_129 {dimension_numbers = #tpu.dot_dimension_numbers<[1], [0], [0], [1], [0, 0, 1, 1], [], []>} : vector<8x128xbf16>, vector<128x128xbf16>, vector<8x128xf32> -> vector<8x128xf32>
    %c0_130 = arith.constant 0 : index
    %c0_131 = arith.constant 0 : index
    %240 = vector.load %arg10[%c0_130, %c0_131] : memref<1x128xf32, #tpu.memory_space<vmem>>, vector<1x128xf32>
    %241 = vector.broadcast %240 : vector<1x128xf32> to vector<8x128xf32>
    %242 = arith.addf %239, %241 : vector<8x128xf32>
    %c0_132 = arith.constant 0 : index
    %c0_133 = arith.constant 0 : index
    %c0_134 = arith.constant 0 : index
    %243 = vector.load %arg11[%c0_132, %c0_133, %c0_134] : memref<1x8x128xf32, #tpu.memory_space<vmem>>, vector<1x8x128xf32>
    %244 = vector.shape_cast %243 : vector<1x8x128xf32> to vector<8x128xf32>
    %245 = vector.shape_cast %242 : vector<8x128xf32> to vector<1x8x128xf32>
    tpu.vector_store %arg11[%c0_132, %c0_133, %c0_134], %245 {strides = array<i32>} : memref<1x8x128xf32, #tpu.memory_space<vmem>>, vector<1x8x128xf32>,
    return
  }
  func.func @transform_1(%arg0: i32, %arg1: i32) -> (i32, i32) {
    %c0_i32 = arith.constant 0 : i32
    %c0_i32_0 = arith.constant 0 : i32
    %c0_i32_1 = arith.constant 0 : i32
    return %c0_i32, %c0_i32_0 : i32, i32
  }
  func.func @transform_2(%arg0: i32, %arg1: i32) -> (i32, i32) {
    %c0_i32 = arith.constant 0 : i32
    %c0_i32_0 = arith.constant 0 : i32
    %c0_i32_1 = arith.constant 0 : i32
    return %c0_i32, %c0_i32_0 : i32, i32
  }
  func.func @transform_3(%arg0: i32, %arg1: i32) -> (i32, i32) {
    %c0_i32 = arith.constant 0 : i32
    %c0_i32_0 = arith.constant 0 : i32
    %c0_i32_1 = arith.constant 0 : i32
    return %c0_i32, %c0_i32_0 : i32, i32
  }
  func.func @transform_4(%arg0: i32, %arg1: i32) -> (i32, i32) {
    %c0_i32 = arith.constant 0 : i32
    %c0_i32_0 = arith.constant 0 : i32
    %c0_i32_1 = arith.constant 0 : i32
    return %c0_i32, %c0_i32_0 : i32, i32
  }
  func.func @transform_5(%arg0: i32, %arg1: i32) -> (i32, i32) {
    %c0_i32 = arith.constant 0 : i32
    %c0_i32_0 = arith.constant 0 : i32
    %c0_i32_1 = arith.constant 0 : i32
    return %c0_i32, %c0_i32_0 : i32, i32
  }
  func.func @transform_6(%arg0: i32, %arg1: i32) -> (i32, i32) {
    %c0_i32 = arith.constant 0 : i32
    %c0_i32_0 = arith.constant 0 : i32
    %c0_i32_1 = arith.constant 0 : i32
    return %c0_i32, %c0_i32_0 : i32, i32
  }
  func.func @transform_7(%arg0: i32, %arg1: i32) -> (i32, i32) {
    %c0_i32 = arith.constant 0 : i32
    %c0_i32_0 = arith.constant 0 : i32
    %c0_i32_1 = arith.constant 0 : i32
    return %c0_i32, %c0_i32_0 : i32, i32
  }
  func.func @transform_8(%arg0: i32, %arg1: i32) -> (i32, i32) {
    %c0_i32 = arith.constant 0 : i32
    %c0_i32_0 = arith.constant 0 : i32
    %c0_i32_1 = arith.constant 0 : i32
    return %c0_i32, %c0_i32_0 : i32, i32
  }
  func.func @transform_9(%arg0: i32, %arg1: i32) -> (i32, i32, i32) {
    %c0_i32 = arith.constant 0 : i32
    %c0_i32_0 = arith.constant 0 : i32
    return %arg0, %arg1, %c0_i32 : i32, i32, i32
  }
}

</mosaic_0001>

<bundles_post_ra>
// kernel: tpu_custom_call.1
= control target key start
LH: loop header
LB: loop body
LE: loop exit
PB: predicated region body
PF: predicated region fallthrough
CT: control target
= control target key end

     0   :  { %s2331_s0 = inlined_call_operand.hbm [shape: f32[2,40,128], index: 0, kind: input, shape index: {}]   ;;  %s2332_s1 = inlined_call_operand.hbm [shape: bf16[128,128], index: 1, kind: input, shape index: {}]   ;;  %s2333_s2 = inlined_call_operand.vmem [shape: f32[1,128], index: 2, kind: input, shape index: {}]   ;;  %s2334_s3 = inlined_call_operand.hbm [shape: bf16[128,128], index: 3, kind: input, shape index: {}]   ;;  %s2335_s4 = inlined_call_operand.vmem [shape: f32[1,128], index: 4, kind: input, shape index: {}]   ;;  %s2336_s5 = inlined_call_operand.hbm [shape: f32[32,128], index: 5, kind: input, shape index: {}]   ;;  %s2337_s6 = inlined_call_operand.vmem [shape: f32[1,128], index: 6, kind: input, shape index: {}]   ;;  %s2338_s7 = inlined_call_operand.hbm [shape: bf16[128,128], index: 7, kind: input, shape index: {}]   ;;  %s2339_s8 = inlined_call_operand.vmem [shape: f32[1,128], index: 8, kind: input, shape index: {}]   ;;  %s2340_s9 = inlined_call_operand.hbm [shape: f32[2,8,128], index: 9, kind: output, shape index: {}]  }
   0x1   :  { %2352 = sst [smem:[#allocation31_spill]] %s2334_s3 }
   0x2   :  { %14 = vsyncpa [#allocation6], 0 }
   0x3   :  { %15 = vsyncpa [#allocation9], 0 }
   0x4   :  { %16 = vsyncpa [#allocation12], 0 }
   0x5   :  { %17 = vsyncpa [#allocation7], 0 }
   0x6   :  { %19 = vsyncpa [#allocation7 + $0x1], 0  ;;  %s1995_s30 = smov 0   ;;  %s1997_s10 = smov 0  }
   0x7   :  { %s1999_s11 = smov 0   ;;  %s2001_s12 = smov 0  }
   0x8   :  { %s2003_s13 = smov 0   ;;  %s2005_s14 = smov 0  }
   0x9 LB: > { %2353 = sst [smem:[#allocation25_spill]] %s1911_s30  ;;  %s1355_s15 = sadd.s32 4294967295, %s1931_s14   ;;  %s1931_s14 = sphi %s2005_s14, %s25_s14   ;;  %s1927_s13 = sphi %s2003_s13, %s2380_s13   ;;  %s1923_s12 = sphi %s2001_s12, %s2376_s12   ;;  %s1919_s11 = sphi %s1999_s11, %s2375_s11   ;;  %s1915_s10 = sphi %s1997_s10, %s2379_s10   ;;  %s1911_s30 = sphi %s1995_s30, %s2378_s30  }
   0xa   : > { %2354 = sst [smem:[#allocation26_spill]] %s1919_s11  ;;  %s1356_s16 = sadd.s32 4294967294, %s1931_s14  }
   0xb   : > { %2355 = sst [smem:[#allocation27_spill]] %s1927_s13  ;;  %s37_s17 = sadd.s32 1, %s1927_s13 }
   0xc   : > { %s214_s18 = sadd.s32 1, %s1919_s11  ;;  %p39_p0 = scmp.ge.s32.totalorder %s37_s17, 2 }
   0xd   : > { %p224_p1 = scmp.ne.s32.totalorder %s1919_s11, %s1915_s10  ;;  %p225_p2 = scmp.eq.s32.totalorder %s1355_s15, 1 }
   0xe   : > { %p230_p3 = scmp.ne.s32.totalorder %s1915_s10, %s1911_s30  ;;  %s2382_s17 = smov (%p39_p0, %s37_s17), 0 }
   0xf   : > { %2356 = sst [smem:[#allocation28_spill]] %s2382_s17  ;;  %p2035_p4 = por %p225_p2, %p224_p1 }
  0x10   : > { %p231_p5 = scmp.eq.s32.totalorder %s1356_s16, 1  ;;  %s209_s20 = ssub.s32 %s1927_s13, %s2382_s17 }
  0x11   : > { %s2357_s19 = scalar_select %p2035_p4, 1, 0 }
  0x12   : > { %p1357_p6 = scmp.ge.s32.totalorder %s1931_s14, 1  ;;  %p212_p7 = scmp.eq.s32.totalorder %s209_s20, 0 }
  0x13   : > { %p2042_p8 = por %p231_p5, %p230_p3  ;;  %p238_p9 = scmp.lt.s32.totalorder %s1931_s14, 3 }
  0x14   : > { %s2048_s22 = scalar_select %p212_p7, %s1919_s11, %s214_s18  }
  0x15   : > { %s2358_s21 = scalar_select %p2042_p8, 1, 0 }
  0x16   : > { %2360 = sst [smem:[#allocation30_spill]] %s2048_s22  ;;  %p2050_p10 = pnand %p1357_p6, %p238_p9 }
  0x17   : > { %2359 = sst [smem:[#allocation29_spill]] %s2358_s21  ;;  %p2054_p11 = scmp.eq.s32.totalorder %s1355_s15, 0 }
  0x18   : > { %s2361_s23 = scalar_select %p2050_p10, 1, 0 }
  0x19   : > { %s2362_s24 = scalar_select %p2054_p11, 1, 0 }
  0x1a   : > { %p1572_p12 = pneg %p2050_p10  ;;  %s1933_s25 = smov [#allocation8]  }
  0x1b   : > { %s266_s26 = sshll.u32 %s1933_s25, 4  ;;  %s1934_s28 = smov [#allocation5]   ;;  %s267_s26 = int_to_ptr.vmem [resolvable:$true] %s266_s26 }
  0x1c   : > { %p2062_p13 = pnand %p2054_p11, %p1572_p12  ;;  %s250_s29 = sshll.u32 %s1934_s28, 4  ;;  %s251_s29 = int_to_ptr.vmem [resolvable:$true] %s250_s29 }
  0x1d   : > { %s2364_s3 = sld [smem:[#allocation31_spill]] }
  0x1e   : > { %p2074_p1 = pneg %p2062_p13 }
  0x23   : > { %s1703_s15 = scalar_lea.hbm %s2364_s3, 1024 }
  0x24   : > { %p1704_p0 = scmp.ne.s32.totalorder %s2364_s3, %s1703_s15  ;;  %p1710_p5 = scmp.lt.u32.totalorder %s1703_s15, %s2364_s3 }
  0x26   : > { %p1706_p2 = pnand %p2074_p1, %p1704_p0 }
  0x28   : > { %p1707_p3 = pneg %p1706_p2 }
  0x2a   : > { %p1712_p6 = pnand %p1710_p5, %p1707_p3 }
  0x2c   : > { %1715 = shalt.err (!%p1712_p6)
}
  0x2d   : > { %s1716_s28 = scalar_lea.vmem %s267_s26, 1024  ;;  %p1724_p8 = scmp.lt.s32.totalorder %s267_s26, %s267_s26 }
  0x2e   : > { %p1717_p7 = scmp.ne.s32.totalorder %s267_s26, %s1716_s28  ;;  %p1725_p4 = scmp.lt.s32.totalorder %s1716_s28, %s1716_s28 }
  0x30   : > { %p1719_p9 = pnand %p1717_p7, %p2074_p1  ;;  %p1726_p11 = por %p1725_p4, %p1724_p8 }
  0x32   : > { %p1720_p12 = pneg %p1719_p9 }
  0x34   : > { %p1727_p10 = pnand %p1726_p11, %p1720_p12 }
  0x36   : > { %1730 = shalt.err (!%p1727_p10)
}
  0x37   : > { %s2350_s17 = smov 64   ;;  %s2351_s16 = smov 4  }
  0x38   : > { %1578 = dma.hbm_to_vmem [thread:$0]  (!%p2062_p13), %s2364_s3, 1024, %s267_s26, [#allocation9], %s2350_s17, %s2350_s17, %s2351_s16  }
  0x39   : > { %s1731_s20 = scalar_lea.hbm %s2332_s1, 1024 }
  0x3a   : > { %p1732_p4 = scmp.ne.s32.totalorder %s2332_s1, %s1731_s20  ;;  %p1738_p11 = scmp.lt.u32.totalorder %s1731_s20, %s2332_s1 }
  0x3c   : > { %p1734_p8 = pnand %p1732_p4, %p2074_p1 }
  0x3e   : > { %p1735_p10 = pneg %p1734_p8 }
  0x40   : > { %p1740_p0 = pnand %p1738_p11, %p1735_p10 }
  0x42   : > { %1743 = shalt.err (!%p1740_p0)
}
  0x43   : > { %s1744_s13 = scalar_lea.vmem %s251_s29, 1024  ;;  %p1752_p6 = scmp.lt.s32.totalorder %s251_s29, %s251_s29 }
  0x44   : > { %p1745_p2 = scmp.ne.s32.totalorder %s251_s29, %s1744_s13  ;;  %p1753_p7 = scmp.lt.s32.totalorder %s1744_s13, %s1744_s13 }
  0x46   : > { %p1747_p3 = pnand %p1745_p2, %p2074_p1  ;;  %p1754_p9 = por %p1753_p7, %p1752_p6 }
  0x48   : > { %p1748_p5 = pneg %p1747_p3 }
  0x4a   : > { %p1755_p12 = pnand %p1754_p9, %p1748_p5 }
  0x4c   : > { %1758 = shalt.err (!%p1755_p12)
}
  0x4d   : > { %1575 = dma.hbm_to_vmem [thread:$0]  (!%p2062_p13), %s2332_s1, 1024, %s251_s29, [#allocation6], %s2350_s17, %s2350_s17, %s2351_s16  }
  0x4e   : > { %s1937_s21 = smov [#allocation10]   ;;  %s1759_s15 = scalar_lea.hbm %s2336_s5, 512 }
  0x4f   : > { %s282_s26 = sshll.u32 %s1937_s21, 4  ;;  %p1760_p4 = scmp.ne.s32.totalorder %s2336_s5, %s1759_s15  ;;  %s283_s26 = int_to_ptr.vmem [resolvable:$true] %s282_s26 }
  0x50   : > { %p1766_p11 = scmp.lt.u32.totalorder %s1759_s15, %s2336_s5 }
  0x51   : > { %p1762_p8 = pnand %p1760_p4, %p2074_p1 }
  0x53   : > { %p1763_p10 = pneg %p1762_p8 }
  0x55   : > { %p1768_p0 = pnand %p1766_p11, %p1763_p10 }
  0x57   : > { %1771 = shalt.err (!%p1768_p0)
}
  0x58   : > { %s1772_s29 = scalar_lea.vmem %s283_s26, 512  ;;  %p1780_p6 = scmp.lt.s32.totalorder %s283_s26, %s283_s26 }
  0x59   : > { %p1773_p2 = scmp.ne.s32.totalorder %s283_s26, %s1772_s29  ;;  %p1781_p7 = scmp.lt.s32.totalorder %s1772_s29, %s1772_s29 }
  0x5b   : > { %p1775_p3 = pnand %p1773_p2, %p2074_p1  ;;  %p1782_p9 = por %p1781_p7, %p1780_p6 }
  0x5d   : > { %p1776_p5 = pneg %p1775_p3 }
  0x5f   : > { %p1783_p12 = pnand %p1782_p9, %p1776_p5 }
  0x61   : > { %1786 = shalt.err (!%p1783_p12)
}
  0x62   : > { %s1938_s30 = smov 128   ;;  %s1939_s11 = smov 8  }
  0x63   : > { %1581 = dma.hbm_to_vmem [thread:$0]  (!%p2062_p13), %s2336_s5, 512, %s283_s26, [#allocation9], %s1938_s30, %s1938_s30, %s1939_s11  }
  0x64   : > { %s1940_s22 = smov [#allocation11]   ;;  %s1787_s28 = scalar_lea.hbm %s2338_s7, 1024 }
  0x65   : > { %s298_s18 = sshll.u32 %s1940_s22, 4  ;;  %p1788_p4 = scmp.ne.s32.totalorder %s2338_s7, %s1787_s28  ;;  %s299_s18 = int_to_ptr.vmem [resolvable:$true] %s298_s18 }
  0x66   : > { %p1794_p11 = scmp.lt.u32.totalorder %s1787_s28, %s2338_s7 }
  0x67   : > { %p1790_p8 = pnand %p1788_p4, %p2074_p1 }
  0x69   : > { %p1791_p10 = pneg %p1790_p8 }
  0x6b   : > { %p1796_p0 = pnand %p1794_p11, %p1791_p10 }
  0x6d   : > { %1799 = shalt.err (!%p1796_p0)
}
  0x6e   : > { %s1800_s26 = scalar_lea.vmem %s299_s18, 1024  ;;  %p1808_p6 = scmp.lt.s32.totalorder %s299_s18, %s299_s18 }
  0x6f   : > { %p1801_p2 = scmp.ne.s32.totalorder %s299_s18, %s1800_s26  ;;  %p1809_p7 = scmp.lt.s32.totalorder %s1800_s26, %s1800_s26 }
  0x71   : > { %p1803_p3 = pnand %p1801_p2, %p2074_p1  ;;  %p1810_p9 = por %p1809_p7, %p1808_p6 }
  0x73   : > { %p1804_p5 = pneg %p1803_p3 }
  0x75   : > { %p1811_p12 = pnand %p1810_p9, %p1804_p5 }
  0x77   : > { %1814 = shalt.err (!%p1811_p12)
}
  0x78   : > { %s2366_s30 = smov 4   ;;  %s2367_s11 = smov 64  }
  0x79   : > { %1584 = dma.hbm_to_vmem [thread:$0]  (!%p2062_p13), %s2338_s7, 1024, %s299_s18, [#allocation12], %s2367_s11, %s2367_s11, %s2366_s30  }
  0x7a   : > { %p2368_p4 = scmp.ne.s32.totalorder %s2361_s23, 0 }
  0x7b   : > { %p2369_p1 = scmp.ne.s32.totalorder (!%p2368_p4), %s2362_s24, 0 }
  0x7c   : > { %317 = sbr.rel (%p2368_p4) target bundleno = 1055 (0x41f), region = 52 }
  0x83   : > { %1892 = dma.done.wait (%p2369_p1), [#allocation6], 1024  }
  0x84   : > { %1894 = vsyncadd (%p2369_p1), [#allocation6], 4294966272 }
  0x85   : > { %1896 = dma.done.wait (%p2369_p1), [#allocation9], 1536  }
  0x86   : > { %1898 = vsyncadd (%p2369_p1), [#allocation9], 4294965760 }
  0x87   : > { %1900 = dma.done.wait (%p2369_p1), [#allocation12], 1024  }
  0x88   : > { %1902 = vsyncadd (%p2369_p1), [#allocation12], 4294966272  ;;  %s355_s23 = sand.u32 1, %s1915_s10   ;;  %s1446_s27 = smul.u32 640, %s1923_s12 }
  0x89   : > { %s2171_s25 = sshll.u32 %s355_s23, 3  ;;  %s1941_s18 = smov [#allocation2]  }
  0x8a   : > { %s372_s22 = scalar_lea.hbm %s2331_s0, %s1446_s27  ;;  %s380_s15 = sshll.u32 %s1941_s18, 4  ;;  %s381_s15 = int_to_ptr.vmem [resolvable:$true] %s380_s15 }
  0x8b   : > { %s1815_s20 = scalar_lea.hbm %s372_s22, 640  ;;  %s1817_s13 = scalar_lea.hbm %s2331_s0, 1280 }
  0x8c   : > { %p1816_p13 = scmp.ne.s32.totalorder %s372_s22, %s1815_s20  ;;  %p1818_p8 = scmp.lt.u32.totalorder %s372_s22, %s2331_s0 }
  0x8d   : > { %p1819_p10 = scmp.lt.u32.totalorder %s1817_s13, %s1815_s20  ;;  %p1821_p0 = scmp.lt.u32.totalorder %s1815_s20, %s372_s22 }
  0x8f   : > { %p1820_p11 = por %p1819_p10, %p1818_p8 }
  0x91   : > { %p1822_p2 = por %p1821_p0, %p1820_p11 }
  0x93   : > { %p1823_p3 = pnand %p1822_p2, %p1816_p13 }
  0x95   : > { %1826 = shalt.err (!%p1823_p3)  }
  0x96   : > { %s1827_s30 = scalar_lea.vmem %s381_s15, 640  ;;  %s1831_s11 = scalar_lea.vmem %s381_s15, 1280 }
  0x97   : > { %p1828_p5 = scmp.ne.s32.totalorder %s381_s15, %s1827_s30  ;;  %p1832_p6 = scmp.lt.s32.totalorder %s381_s15, %s381_s15 }
  0x98   : > { %p1833_p7 = scmp.lt.s32.totalorder %s1831_s11, %s1827_s30 }
  0x9a   : > { %p1834_p9 = por %p1833_p7, %p1832_p6 }
  0x9c   : > { %p1835_p12 = pnand %p1834_p9, %p1828_p5 }
  0x9e   : > { %1838 = shalt.err (!%p1835_p12)  }
  0x9f   : > { %383 = dma.hbm_to_vmem [thread:$0]  %s372_s22, 640, %s381_s15, [#allocation3] }
  0xa0   : > { %s357_s17 = scalar_lea.vmem [#allocation13], %s2171_s25 }
  0xa1   : > { %1903 = dma.done.wait [#allocation3], 640 }
  0xa2   : > { %1904 = vsyncadd [#allocation3], 4294966656  ;;  %v416_v0 = vld [vmem:[#allocation2] sm:$0xff]  ;;  %v418_v1 = vld [vmem:[#allocation2 + $0x10] sm:$0xff]  ;;  %v1942_v6 = vmov 0.0   ;;  %vm1943_vm0 = vmmov 0  }
  0xa3   : > { %v417_v2 = vld [vmem:[#allocation2 + $0x8] sm:$0xff]  ;;  %421 = vadd.xlane.f32.xlu0 %v416_v0  ;;  %425 = vadd.xlane.f32.xlu1 %v418_v1  ;;  %v419_v3 = vld [vmem:[#allocation2 + $0x18] sm:$0xff]  ;;  %835 = vst [vmem:[#allocation4] sm:$0xff] %v1942_v6  ;;  %838 = vst [vmem:[#allocation4 + $0x18] sm:$0xff] %v1942_v6  ;;  %s1441_s28 = sshll.u32 %s1923_s12, 7  ;;  %s1230_s24 = sshll.u32 %s357_s17, 4  ;;  %s2282_s24 = int_to_ptr.vmem [resolvable:$true] %s1230_s24 }
  0xa4   : > { %v1657_v4 = vld [vmem:[#allocation5] sm:$0xff]   ;;  %1478 = vmatprep.subr.bf16.mxu0 %v1942_v6  ;;  %839 = vst [vmem:[#allocation4 + $0x20] sm:$0xff] %v1942_v6  ;;  %1506 = vmatprep.subr.bf16.mxu1 %v1942_v6  ;;  %v2212_v23 = vld [vmem:[#allocation2 + $0x20] sm:$0xff]  ;;  %v1661_v26 = vld [vmem:[#allocation5 + $0x10] sm:$0xff]   ;;  %s2280_s26 = scalar_lea.hbm %s2340_s9, %s1441_s28  ;;  %s1216_s12 = scalar_lea.sflag [#allocation7], %s355_s23 }
  0xa5   : > { %v1658_v5 = vld [vmem:[#allocation8] sm:$0xff]   ;;  %1479 = vmatpush3.bf16.msra.mxu0 %v1657_v4  ;;  %v1659_v24 = vld [vmem:[#allocation5 + $0x8] sm:$0xff]   ;;  %v1662_v27 = vld [vmem:[#allocation8 + $0x10] sm:$0xff]   ;;  %1494 = vmatprep.mubr.msk.bf16.mxu0 %vm1943_vm0, %v1942_v6  ;;  %s1839_s30 = scalar_lea.vmem %s2282_s24, 128  ;;  %p2370_p1 = scmp.ne.s32.totalorder %s2357_s19, 0 }
  0xa6   : > { %1507 = vmatpush3.bf16.msra.mxu1 %v1658_v5  ;;  %1480 = vmatprep.subr.bf16.mxu0 %v1942_v6  ;;  %v1660_v25 = vld [vmem:[#allocation8 + $0x8] sm:$0xff]   ;;  %v1663_v28 = vld [vmem:[#allocation5 + $0x18] sm:$0xff]   ;;  %v1665_v30 = vld [vmem:[#allocation5 + $0x20] sm:$0xff]   ;;  %p1840_p4 = scmp.ne.s32.totalorder %s2282_s24, %s1839_s30  ;;  %s1944_s11 = smov [#allocation13]  }
  0xa7   : > { %423 = vadd.xlane.f32.xlu0 %v417_v2  ;;  %427 = vadd.xlane.f32.xlu1 %v419_v3  ;;  %v1664_v29 = vld [vmem:[#allocation8 + $0x18] sm:$0xff]   ;;  %v1666_v31 = vld [vmem:[#allocation8 + $0x20] sm:$0xff]   ;;  %v1667_v32 = vld [vmem:[#allocation5 + $0x28] sm:$0xff]   ;;  %s1843_s16 = sshll.u32 %s1944_s11, 4  ;;  %s1844_s16 = int_to_ptr.vmem [resolvable:$false] %s1843_s16 }
  0xa8   : > { %1508 = vmatprep.subr.bf16.mxu1 %v1942_v6  ;;  %v1668_v33 = vld [vmem:[#allocation8 + $0x28] sm:$0xff]   ;;  %v1669_v34 = vld [vmem:[#allocation5 + $0x30] sm:$0xff]   ;;  %1522 = vmatprep.mubr.msk.bf16.mxu1 %vm1943_vm0, %v1942_v6  ;;  %v1671_v36 = vld [vmem:[#allocation5 + $0x38] sm:$0xff]   ;;  %p1841_p13 = pnand %p1840_p4, %p2370_p1  ;;  %s1845_s27 = scalar_lea.vmem %s1844_s16, 256 }
  0xa9   : > { %1481 = vmatpush3.bf16.msra.mxu0 %v1659_v24  ;;  %v1670_v35 = vld [vmem:[#allocation8 + $0x30] sm:$0xff]   ;;  %v1672_v37 = vld [vmem:[#allocation8 + $0x38] sm:$0xff]   ;;  %v1673_v24 = vld [vmem:[#allocation11] sm:$0xff]   ;;  %p1846_p10 = scmp.lt.s32.totalorder %s2282_s24, %s1844_s16  ;;  %p1847_p11 = scmp.lt.s32.totalorder %s1845_s27, %s1839_s30 }
  0xaa   : > { %1509 = vmatpush3.bf16.msra.mxu1 %v1660_v25  ;;  %1482 = vmatprep.subr.bf16.mxu0 %v1942_v6  ;;  %p1842_p8 = pneg %p1841_p13 }
  0xab   : > { %1510 = vmatprep.subr.bf16.mxu1 %v1942_v6  ;;  %p1848_p0 = por %p1847_p11, %p1846_p10 }
  0xad   : > { %1483 = vmatpush3.bf16.msra.mxu0 %v1661_v26  ;;  %p1849_p2 = pnand %p1848_p0, %p1842_p8 }
  0xae   : > { %1511 = vmatpush3.bf16.msra.mxu1 %v1662_v27  ;;  %1484 = vmatprep.subr.bf16.mxu0 %v1942_v6  ;;  %v1674_v27 = vld [vmem:[#allocation11 + $0x8] sm:$0xff]  }
  0xaf   : > { %1512 = vmatprep.subr.bf16.mxu1 %v1942_v6 }
  0xb1   : > { %1485 = vmatpush3.bf16.msra.mxu0 %v1663_v28 }
  0xb2   : > { %1513 = vmatpush3.bf16.msra.mxu1 %v1664_v29  ;;  %1486 = vmatprep.subr.bf16.mxu0 %v1942_v6  ;;  %v1675_v29 = vld [vmem:[#allocation11 + $0x10] sm:$0xff]  }
  0xb3   : > { %1514 = vmatprep.subr.bf16.mxu1 %v1942_v6 }
  0xb5   : > { %1487 = vmatpush3.bf16.msra.mxu0 %v1665_v30  ;;  %v1676_v30 = vld [vmem:[#allocation11 + $0x18] sm:$0xff]  }
  0xb6   : > { %1515 = vmatpush3.bf16.msra.mxu1 %v1666_v31  ;;  %1488 = vmatprep.subr.bf16.mxu0 %v1942_v6  ;;  %v1677_v31 = vld [vmem:[#allocation11 + $0x20] sm:$0xff]  }
  0xb7   : > { %1516 = vmatprep.subr.bf16.mxu1 %v1942_v6 }
  0xb9   : > { %1489 = vmatpush3.bf16.msra.mxu0 %v1667_v32  ;;  %v1678_v32 = vld [vmem:[#allocation11 + $0x28] sm:$0xff]  }
  0xba   : > { %1517 = vmatpush3.bf16.msra.mxu1 %v1668_v33  ;;  %1490 = vmatprep.subr.bf16.mxu0 %v1942_v6  ;;  %v1679_v33 = vld [vmem:[#allocation11 + $0x30] sm:$0xff]  }
  0xbb   : > { %1518 = vmatprep.subr.bf16.mxu1 %v1942_v6 }
  0xbd   : > { %1491 = vmatpush3.bf16.msra.mxu0 %v1669_v34  ;;  %v1680_v34 = vld [vmem:[#allocation11 + $0x38] sm:$0xff]  }
  0xbe   : > { %1519 = vmatpush3.bf16.msra.mxu1 %v1670_v35  ;;  %1492 = vmatprep.subr.bf16.mxu0 %v1942_v6 }
  0xbf   : > { %1520 = vmatprep.subr.bf16.mxu1 %v1942_v6 }
  0xc1   : > { %1493 = vmatpush3.bf16.msra.mxu0 %v1671_v36 }
  0xc2   : > { %1521 = vmatpush3.bf16.msra.mxu1 %v1672_v37  ;;  %1534 = vmatprep.subr.bf16.mxu0 %v1942_v6  ;;  %v1379_v37 = vld [vmem:[%s2335_s4] ss:$0 sm:$0xff] }
 0x130   : > { %v422_v7 = vpop.xlane.xlu0 %421  ;;  %v426_v8 = vpop.xlane.xlu1 %425 }
 0x131   : > { %v2190_v9 = vmul.f32 0.03125, %v422_v7  ;;  %v2192_v10 = vmul.f32 0.03125, %v426_v8 }
 0x133   : > { %v2195_v11 = vsub.f32 %v416_v0, %v2190_v9  ;;  %v2198_v12 = vsub.f32 %v418_v1, %v2192_v10  ;;  %v456_v38 = vmul.f32 %v2190_v9, %v2190_v9  ;;  %v458_v39 = vmul.f32 %v2192_v10, %v2192_v10 }
 0x134   : > { %v424_v13 = vpop.xlane.xlu0 %423  ;;  %v428_v14 = vpop.xlane.xlu1 %427 }
 0x135   : > { %v432_v15 = vmul.f32 0.03125, %v424_v13  ;;  %v441_v16 = vmul.f32 %v2195_v11, %v2195_v11  ;;  %v434_v17 = vmul.f32 0.03125, %v428_v14  ;;  %v443_v20 = vmul.f32 %v2198_v12, %v2198_v12 }
 0x136   : > { %v461_v41 = vmul.f32 96.0, %v456_v38  ;;  %v463_v47 = vmul.f32 96.0, %v458_v39 }
 0x137   : > { %v2202_v18 = vsub.f32 %v417_v2, %v432_v15  ;;  %446 = vadd.xlane.f32.xlu0 %v441_v16  ;;  %v2204_v19 = vsub.f32 %v419_v3, %v434_v17  ;;  %v457_v40 = vmul.f32 %v432_v15, %v432_v15  ;;  %v459_v44 = vmul.f32 %v434_v17, %v434_v17 }
 0x139   : > { %v442_v21 = vmul.f32 %v2202_v18, %v2202_v18  ;;  %v444_v22 = vmul.f32 %v2204_v19, %v2204_v19  ;;  %v462_v46 = vmul.f32 96.0, %v457_v40  ;;  %v464_v56 = vmul.f32 96.0, %v459_v44 }
 0x13b   : > { %450 = vadd.xlane.f32.xlu0 %v443_v20  ;;  %448 = vadd.xlane.f32.xlu1 %v442_v21 }
 0x13f   : > { %452 = vadd.xlane.f32.xlu1 %v444_v22  ;;  %429 = vadd.xlane.f32.xlu0 %v2212_v23 }
 0x1c4   : > { %v447_v42 = vpop.xlane.xlu0 %446 }
 0x1c5   : > { %v466_v43 = vsub.f32 %v447_v42, %v461_v41 }
 0x1c7   : > { %v471_v45 = vmul.f32 0.03125, %v466_v43 }
 0x1c8   : > { %v449_v48 = vpop.xlane.xlu1 %448  ;;  %v451_v49 = vpop.xlane.xlu0 %450 }
 0x1c9   : > { %v476_v50 = vmax.f32 %v471_v45, 0.0  ;;  %v467_v51 = vsub.f32 %v449_v48, %v462_v46  ;;  %v468_v52 = vsub.f32 %v451_v49, %v463_v47 }
 0x1cb   : > { %v481_v53 = vadd.f32 1e-05, %v476_v50  ;;  %v472_v54 = vmul.f32 0.03125, %v467_v51  ;;  %v473_v55 = vmul.f32 0.03125, %v468_v52 }
 0x1cc   : > { %v453_v57 = vpop.xlane.xlu1 %452  ;;  %v430_v58 = vpop.xlane.xlu0 %429 }
 0x1cd   : > { %v477_v59 = vmax.f32 %v472_v54, 0.0  ;;  %v478_v60 = vmax.f32 %v473_v55, 0.0  ;;  %v469_v61 = vsub.f32 %v453_v57, %v464_v56  ;;  %v435_v62 = vmul.f32 0.03125, %v430_v58 }
 0x1ce   : > { %1681 = vrsqrt.f32 %v481_v53  ;;  %v788_v55 = vlaneseq }
 0x1cf   : > { %v482_v63 = vadd.f32 1e-05, %v477_v59  ;;  %v483_v0 = vadd.f32 1e-05, %v478_v60  ;;  %v474_v1 = vmul.f32 0.03125, %v469_v61  ;;  %v440_v2 = vsub.f32 %v2212_v23, %v435_v62 }
 0x1d0   : > { %v789_v58 = vshrl.u32 %v788_v55, 7 }
 0x1d1   : > { %1683 = vrsqrt.f32 %v482_v63  ;;  %v479_v3 = vmax.f32 %v474_v1, 0.0  ;;  %v445_v4 = vmul.f32 %v440_v2, %v440_v2 }
 0x1d2   : > { %1685 = vrsqrt.f32 %v483_v0  ;;  %v790_v59 = vadd.s32 8, %v789_v58  ;;  %v791_v0 = vadd.s32 16, %v789_v58 }
 0x1d3   : > { %v484_v5 = vadd.f32 1e-05, %v479_v3  ;;  %454 = vadd.xlane.f32.xlu1 %v445_v4 }
 0x1d4   : > { %v1394_v63 = vadd.s32 4294967281, %v790_v59  ;;  %v1395_v4 = vadd.s32 4294967281, %v791_v0 }
 0x1d5   : > { %1687 = vrsqrt.f32 %v484_v5 }
 0x1d6   : > { %vm806_vm1 = vcmp.ge.s32.totalorder %v1394_v63, 0  ;;  %vm812_vm2 = vcmp.lt.s32.totalorder %v1395_v4, 8  ;;  %v1414_v4 = vld [vmem:[#allocation10 + $0x10] ss:$0 sm:$0xff] }
 0x1d8   : > { %v1682_v7 = vpop.eup %1681 }
 0x1d9   : > { %v491_v9 = vmul.f32 %v1682_v7, %v2195_v11  ;;  %v460_v11 = vmul.f32 %v435_v62, %v435_v62  ;;  %v1370_v62 = vld [vmem:[%s2333_s2] ss:$0 sm:$0xff] }
 0x1db   : > { %v1684_v8 = vpop.eup %1683 }
 0x1dc   : > { %v492_v10 = vmul.f32 %v1684_v8, %v2202_v18  ;;  %v1686_v13 = vpop.eup %1685  ;;  %v465_v18 = vmul.f32 96.0, %v460_v11 }
 0x1dd   : > { %v493_v16 = vmul.f32 %v1686_v13, %v2198_v12  ;;  %v1399_v13 = vld [vmem:[#allocation10 + $0x1] ss:$0 sm:$0xff] }
 0x1de   : > { %v496_v14 = vpack.c.bf16 %v492_v10, %v491_v9  ;;  %v1398_v9 = vld [vmem:[#allocation10] ss:$0 sm:$0xff] }
 0x1df   : > { %v1688_v15 = vpop.eup %1687 }
 0x1e0   : > { %1495 = vmatmul.mubr.bf16.vlgmr.msra.gmra.mrb[0].mxu0 %v496_v14  ;;  %1523 = vmatmul.mubr.bf16.vlgmr.msra.gmra.mrb[0].mxu1 %v496_v14  ;;  %v494_v17 = vmul.f32 %v1688_v15, %v2204_v19  ;;  %v846_v15 = vmul.f32 0.0, %v1398_v9  ;;  %v1415_v9 = vld [vmem:[#allocation10 + $0x11] ss:$0 sm:$0xff] }
 0x1e1   : > { %1498 = vmatprep.mubr.msk.bf16.mxu0 %vm1943_vm0, %v1942_v6  ;;  %1526 = vmatprep.mubr.msk.bf16.mxu1 %vm1943_vm0, %v1942_v6 }
 0x1e2   : > { %v497_v20 = vpack.c.bf16 %v494_v17, %v493_v16  ;;  %1535 = vmatpush3.bf16.msra.mxu0 %v1673_v24 }
 0x1e3   : > { %1536 = vmatprep.subr.bf16.mxu0 %v1942_v6 }
 0x1e6   : > { %1537 = vmatpush3.bf16.msra.mxu0 %v1674_v27  ;;  %v1403_v27 = vld [vmem:[#allocation10 + $0x5] ss:$0 sm:$0xff] }
 0x1e7   : > { %1538 = vmatprep.subr.bf16.mxu0 %v1942_v6 }
 0x1e8   : > { %1499 = vmatmul.mubr.bf16.gmra.mrb[4].mxu0 %v497_v20  ;;  %1527 = vmatmul.mubr.bf16.gmra.mrb[4].mxu1 %v497_v20  ;;  %v1400_v20 = vld [vmem:[#allocation10 + $0x2] ss:$0 sm:$0xff] }
 0x1e9   : > { %1502 = vmatprep.mubr.msk.bf16.mxu0 %vm1943_vm0, %v1942_v6  ;;  %1530 = vmatprep.mubr.msk.bf16.mxu1 %vm1943_vm0, %v1942_v6 }
 0x1ea   : > { %1539 = vmatpush3.bf16.msra.mxu0 %v1675_v29 }
 0x1eb   : > { %1540 = vmatprep.subr.bf16.mxu0 %v1942_v6 }
 0x1ee   : > { %1541 = vmatpush3.bf16.msra.mxu0 %v1676_v30 }
 0x1ef   : > { %1542 = vmatprep.subr.bf16.mxu0 %v1942_v6 }
 0x1f2   : > { %1543 = vmatpush3.bf16.msra.mxu0 %v1677_v31  ;;  %v1404_v31 = vld [vmem:[#allocation10 + $0x6] ss:$0 sm:$0xff] }
 0x1f3   : > { %1544 = vmatprep.subr.bf16.mxu0 %v1942_v6 }
 0x1f6   : > { %1545 = vmatpush3.bf16.msra.mxu0 %v1678_v32 }
 0x1f7   : > { %1546 = vmatprep.subr.bf16.mxu0 %v1942_v6 }
 0x1fa   : > { %1547 = vmatpush3.bf16.msra.mxu0 %v1679_v33 }
 0x1fb   : > { %1548 = vmatprep.subr.bf16.mxu0 %v1942_v6 }
 0x1fe   : > { %1549 = vmatpush3.bf16.msra.mxu0 %v1680_v34 }
 0x260   : > { %v455_v12 = vpop.xlane.xlu1 %454 }
 0x261   : > { %v470_v21 = vsub.f32 %v455_v12, %v465_v18  ;;  %v1401_v12 = vld [vmem:[#allocation10 + $0x3] ss:$0 sm:$0xff] }
 0x263   : > { %v475_v19 = vmul.f32 0.03125, %v470_v21 }
 0x265   : > { %v480_v22 = vmax.f32 %v475_v19, 0.0 }
 0x267   : > { %v485_v23 = vadd.f32 1e-05, %v480_v22 }
 0x269   : > { %1689 = vrsqrt.f32 %v485_v23  ;;  %v1402_v23 = vld [vmem:[#allocation10 + $0x4] ss:$0 sm:$0xff] }
 0x273   : > { %v1690_v25 = vpop.eup %1689 }
 0x274   : > { %v495_v26 = vmul.f32 %v1690_v25, %v440_v2 }
 0x276   : > { %v498_v28 = vpack.c.bf16 %v495_v26, %v495_v26 }
 0x278   : > { %1503 = vmatmul.mubr.bf16.gmra.mrb[8].mxu0 %v498_v28  ;;  %1531 = vmatmul.mubr.bf16.gmra.mrb[8].mxu1 %v498_v28 }
 0x279   : > { %1550 = vmatprep.mubr.msk.bf16.mxu0 %vm1943_vm0, %v1942_v6 }
 0x2b3   : > { %v604_v35 = vpop.f32.mrb[0].mxu0  ;;  %v731_v36 = vpop.f32.mrb[0].mxu1 }
 0x2b4   : > { %v1496_v38 = vpop.f32.mrb[1].mxu0  ;;  %v1524_v39 = vpop.f32.mrb[1].mxu1  ;;  %v1405_v35 = vld [vmem:[#allocation10 + $0x7] ss:$0 sm:$0xff] }
 0x2b5   : > { %v607_v40 = vpop.f32.mrb[2].mxu0  ;;  %v734_v41 = vpop.f32.mrb[2].mxu1  ;;  %v1406_v38 = vld [vmem:[#allocation10 + $0x8] ss:$0 sm:$0xff] }
 0x2b6   : > { %v735_v42 = vadd.f32 %v1379_v37, %v734_v41  ;;  %v1497_v43 = vpop.f32.mrb[3].mxu0  ;;  %v1525_v44 = vpop.f32.mrb[3].mxu1  ;;  %v608_v1 = vadd.f32 %v1370_v62, %v607_v40 }
 0x2b8   : > { %v1389_v45 = vmul.f32 -1.442695, %v735_v42  ;;  %v1407_v42 = vld [vmem:[#allocation10 + $0x9] ss:$0 sm:$0xff] }
 0x2ba   : > { %1691 = vpow2.f32 %v1389_v45 }
 0x2bb   : > { %v612_v46 = vpop.f32.mrb[4].mxu0  ;;  %v739_v47 = vpop.f32.mrb[4].mxu1 }
 0x2bc   : > { %v740_v48 = vadd.f32 %v1379_v37, %v739_v47  ;;  %v1500_v6 = vpop.f32.mrb[5].mxu0  ;;  %v1528_v49 = vpop.f32.mrb[5].mxu1  ;;  %v613_v7 = vadd.f32 %v1370_v62, %v612_v46  ;;  %v1408_v46 = vld [vmem:[#allocation10 + $0xa] ss:$0 sm:$0xff] }
 0x2bd   : > { %v615_v50 = vpop.f32.mrb[6].mxu0  ;;  %v742_v51 = vpop.f32.mrb[6].mxu1  ;;  %v1409_v49 = vld [vmem:[#allocation10 + $0xb] ss:$0 sm:$0xff] }
 0x2be   : > { %v1390_v52 = vmul.f32 -1.442695, %v740_v48  ;;  %v1501_v53 = vpop.f32.mrb[7].mxu0  ;;  %v1529_v54 = vpop.f32.mrb[7].mxu1 }
 0x2bf   : > { %v1410_v53 = vld [vmem:[#allocation10 + $0xc] ss:$0 sm:$0xff] }
 0x2c0   : > { %1693 = vpow2.f32 %v1390_v52 }
 0x2c4   : > { %v1692_v56 = vpop.eup %1691 }
 0x2c5   : > { %v769_v57 = vadd.f32 1.0, %v1692_v56 }
 0x2c7   : > { %1695 = vrcp.f32 %v769_v57  ;;  %v1411_v57 = vld [vmem:[#allocation10 + $0xd] ss:$0 sm:$0xff] }
 0x2ca   : > { %v1694_v60 = vpop.eup %1693 }
 0x2cb   : > { %v770_v61 = vadd.f32 1.0, %v1694_v60 }
 0x2cd   : > { %1697 = vrcp.f32 %v770_v61  ;;  %v1412_v61 = vld [vmem:[#allocation10 + $0xe] ss:$0 sm:$0xff] }
 0x2d1   : > { %v1696_v2 = vpop.eup %1695 }
 0x2d2   : > { %v784_v3 = vmul.f32 %v1696_v2, %v608_v1  ;;  %v1413_v1 = vld [vmem:[#allocation10 + $0xf] ss:$0 sm:$0xff] }
 0x2d4   : > { %v831_v5 = vsel %vm806_vm1, %v784_v3, 0.0 }
 0x2d5   : > { %836 = vst [vmem:[#allocation4 + $0x8] sm:$0xff] %v831_v5  ;;  %v909_v44 = vmul.f32 %v1406_v38, %v831_v5  ;;  %v1423_v38 = vld [vmem:[#allocation10 + $0x19] ss:$0 sm:$0xff] }
 0x2d7   : > { %v1698_v8 = vpop.eup %1697 }
 0x2d8   : > { %v785_v10 = vmul.f32 %v1698_v8, %v613_v7 }
 0x2da   : > { %v2264_v14 = vsel %vm812_vm2, %v785_v10, 0.0 }
 0x2db   : > { %837 = vst [vmem:[#allocation4 + $0x10] sm:$0xff] %v2264_v14 }
 0x2dc   : > { %v847_v16 = vld [vmem:[#allocation4 + $0x1] sm:$0xff] }
 0x2dd   : > { %v855_v17 = vld [vmem:[#allocation4 + $0x2] sm:$0xff]  ;;  %v853_v11 = vmul.f32 %v1399_v13, %v847_v16  ;;  %v973_v13 = vmul.f32 %v1414_v4, %v2264_v14  ;;  %v1416_v16 = vld [vmem:[#allocation10 + $0x12] ss:$0 sm:$0xff] }
 0x2de   : > { %v863_v18 = vld [vmem:[#allocation4 + $0x3] sm:$0xff]  ;;  %v861_v19 = vmul.f32 %v1400_v20, %v855_v17 }
 0x2df   : > { %v854_v21 = vadd.f32 %v853_v11, %v846_v15  ;;  %v871_v22 = vld [vmem:[#allocation4 + $0x4] sm:$0xff]  ;;  %v869_v25 = vmul.f32 %v1401_v12, %v863_v18  ;;  %v1417_v18 = vld [vmem:[#allocation10 + $0x13] ss:$0 sm:$0xff] }
 0x2e0   : > { %v879_v26 = vld [vmem:[#allocation4 + $0x5] sm:$0xff]  ;;  %v877_v29 = vmul.f32 %v1402_v23, %v871_v22  ;;  %v1418_v22 = vld [vmem:[#allocation10 + $0x14] ss:$0 sm:$0xff] }
 0x2e1   : > { %v862_v24 = vadd.f32 %v861_v19, %v854_v21  ;;  %v887_v30 = vld [vmem:[#allocation4 + $0x6] sm:$0xff]  ;;  %v885_v33 = vmul.f32 %v1403_v27, %v879_v26  ;;  %v1419_v26 = vld [vmem:[#allocation10 + $0x15] ss:$0 sm:$0xff] }
 0x2e2   : > { %v895_v34 = vld [vmem:[#allocation4 + $0x7] sm:$0xff]  ;;  %v893_v37 = vmul.f32 %v1404_v31, %v887_v30  ;;  %v959_v0 = vld [vmem:[#allocation4 + $0xf] sm:$0xff]  ;;  %v1420_v30 = vld [vmem:[#allocation10 + $0x16] ss:$0 sm:$0xff] }
 0x2e3   : > { %v870_v28 = vadd.f32 %v869_v25, %v862_v24  ;;  %v901_v40 = vmul.f32 %v1405_v35, %v895_v34  ;;  %v911_v41 = vld [vmem:[#allocation4 + $0x9] sm:$0xff]  ;;  %v965_v7 = vmul.f32 %v1413_v1, %v959_v0  ;;  %v975_v8 = vld [vmem:[#allocation4 + $0x11] sm:$0xff]  ;;  %v1422_v34 = vld [vmem:[#allocation10 + $0x18] ss:$0 sm:$0xff] }
 0x2e4   : > { %v919_v45 = vld [vmem:[#allocation4 + $0xa] sm:$0xff]  ;;  %v917_v48 = vmul.f32 %v1407_v42, %v911_v41  ;;  %v983_v15 = vld [vmem:[#allocation4 + $0x12] sm:$0xff]  ;;  %v981_v20 = vmul.f32 %v1415_v9, %v975_v8  ;;  %v1037_v41 = vmul.f32 0.0, %v1422_v34  ;;  %v1047_v42 = vld [vmem:[#allocation4 + $0x1a] sm:$0xff] }
 0x2e5   : > { %v878_v32 = vadd.f32 %v877_v29, %v870_v28  ;;  %v927_v6 = vld [vmem:[#allocation4 + $0xb] sm:$0xff]  ;;  %v925_v51 = vmul.f32 %v1408_v46, %v919_v45  ;;  %v991_v11 = vld [vmem:[#allocation4 + $0x13] sm:$0xff]  ;;  %v989_v21 = vmul.f32 %v1416_v16, %v983_v15  ;;  %v1055_v46 = vld [vmem:[#allocation4 + $0x1b] sm:$0xff] }
 0x2e6   : > { %v935_v52 = vld [vmem:[#allocation4 + $0xc] sm:$0xff]  ;;  %v933_v55 = vmul.f32 %v1409_v49, %v927_v6  ;;  %v999_v19 = vld [vmem:[#allocation4 + $0x14] sm:$0xff]  ;;  %v997_v24 = vmul.f32 %v1417_v18, %v991_v11  ;;  %v1063_v49 = vld [vmem:[#allocation4 + $0x1c] sm:$0xff] }
 0x2e7   : > { %v886_v36 = vadd.f32 %v885_v33, %v878_v32  ;;  %v943_v56 = vld [vmem:[#allocation4 + $0xd] sm:$0xff]  ;;  %v941_v59 = vmul.f32 %v1410_v53, %v935_v52  ;;  %v1007_v25 = vld [vmem:[#allocation4 + $0x15] sm:$0xff]  ;;  %v1005_v28 = vmul.f32 %v1418_v22, %v999_v19  ;;  %v1421_v33 = vld [vmem:[#allocation10 + $0x17] ss:$0 sm:$0xff] }
 0x2e8   : > { %v951_v60 = vld [vmem:[#allocation4 + $0xe] sm:$0xff]  ;;  %v949_v62 = vmul.f32 %v1411_v57, %v943_v56  ;;  %v1015_v29 = vld [vmem:[#allocation4 + $0x16] sm:$0xff]  ;;  %v1013_v14 = vmul.f32 %v1419_v26, %v1007_v25  ;;  %v1079_v57 = vld [vmem:[#allocation4 + $0x1e] sm:$0xff] }
 0x2e9   : > { %v894_v39 = vadd.f32 %v893_v37, %v886_v36  ;;  %v957_v3 = vmul.f32 %v1412_v61, %v951_v60  ;;  %v1023_v32 = vld [vmem:[#allocation4 + $0x17] sm:$0xff]  ;;  %v1021_v36 = vmul.f32 %v1420_v30, %v1015_v29  ;;  %v1429_v0 = vld [vmem:[%s2337_s6] ss:$0 sm:$0xff] }
 0x2ea   : > { %v1039_v37 = vld [vmem:[#allocation4 + $0x19] sm:$0xff] }
 0x2eb   : > { %v902_v43 = vadd.f32 %v901_v40, %v894_v39  ;;  %v1029_v40 = vmul.f32 %v1421_v33, %v1023_v32  ;;  %v1045_v45 = vmul.f32 %v1423_v38, %v1039_v37  ;;  %v1071_v53 = vld [vmem:[#allocation4 + $0x1d] sm:$0xff] }
 0x2ed   : > { %v910_v47 = vadd.f32 %v909_v44, %v902_v43  ;;  %v1424_v43 = vld [vmem:[#allocation10 + $0x1a] ss:$0 sm:$0xff] }
 0x2ee   : > { %v1053_v6 = vmul.f32 %v1424_v43, %v1047_v42 }
 0x2ef   : > { %v918_v50 = vadd.f32 %v917_v48, %v910_v47  ;;  %v1425_v47 = vld [vmem:[#allocation10 + $0x1b] ss:$0 sm:$0xff] }
 0x2f0   : > { %v1061_v52 = vmul.f32 %v1425_v47, %v1055_v46 }
 0x2f1   : > { %v926_v54 = vadd.f32 %v925_v51, %v918_v50  ;;  %v1426_v50 = vld [vmem:[#allocation10 + $0x1c] ss:$0 sm:$0xff] }
 0x2f2   : > { %v1069_v56 = vmul.f32 %v1426_v50, %v1063_v49 }
 0x2f3   : > { %v934_v58 = vadd.f32 %v933_v55, %v926_v54  ;;  %v1427_v54 = vld [vmem:[#allocation10 + $0x1d] ss:$0 sm:$0xff] }
 0x2f4   : > { %v1077_v60 = vmul.f32 %v1427_v54, %v1071_v53 }
 0x2f5   : > { %v942_v63 = vadd.f32 %v941_v59, %v934_v58  ;;  %v1428_v58 = vld [vmem:[#allocation10 + $0x1e] ss:$0 sm:$0xff] }
 0x2f7   : > { %v950_v2 = vadd.f32 %v949_v62, %v942_v63  ;;  %v1085_v62 = vmul.f32 %v1428_v58, %v1079_v57 }
 0x2f9   : > { %v958_v5 = vadd.f32 %v957_v3, %v950_v2 }
 0x2fb   : > { %v966_v10 = vadd.f32 %v965_v7, %v958_v5 }
 0x2fd   : > { %v974_v17 = vadd.f32 %v973_v13, %v966_v10 }
 0x2ff   : > { %v982_v12 = vadd.f32 %v981_v20, %v974_v17 }
 0x301   : > { %v990_v23 = vadd.f32 %v989_v21, %v982_v12  ;;  %v1431_v12 = vld [vmem:[%s2339_s8] ss:$0 sm:$0xff] }
 0x303   : > { %v998_v27 = vadd.f32 %v997_v24, %v990_v23 }
 0x305   : > { %v1006_v31 = vadd.f32 %v1005_v28, %v998_v27 }
 0x307   : > { %v1014_v35 = vadd.f32 %v1013_v14, %v1006_v31 }
 0x309   : > { %v1022_v39 = vadd.f32 %v1021_v36, %v1014_v35 }
 0x30b   : > { %v1030_v44 = vadd.f32 %v1029_v40, %v1022_v39 }
 0x30d   : > { %v1038_v48 = vadd.f32 %v1037_v41, %v1030_v44 }
 0x30f   : > { %v1046_v51 = vadd.f32 %v1045_v45, %v1038_v48 }
 0x311   : > { %v1054_v55 = vadd.f32 %v1053_v6, %v1046_v51 }
 0x313   : > { %v1062_v59 = vadd.f32 %v1061_v52, %v1054_v55 }
 0x315   : > { %v1070_v61 = vadd.f32 %v1069_v56, %v1062_v59 }
 0x317   : > { %v1078_v63 = vadd.f32 %v1077_v60, %v1070_v61 }
 0x319   : > { %v1086_v1 = vadd.f32 %v1085_v62, %v1078_v63 }
 0x31b   : > { %v1094_v2 = vadd.f32 %v1429_v0, %v1086_v1 }
 0x31d   : > { %v1430_v3 = vmul.f32 -1.442695, %v1094_v2 }
 0x31f   : > { %1699 = vpow2.f32 %v1430_v3 }
 0x329   : > { %v1700_v4 = vpop.eup %1699 }
 0x32a   : > { %v1098_v5 = vadd.f32 1.0, %v1700_v4 }
 0x32c   : > { %1701 = vrcp.f32 %v1098_v5 }
 0x336   : > { %v1702_v7 = vpop.eup %1701 }
 0x337   : > { %v1101_v8 = vmul.f32 %v1702_v7, %v1094_v2 }
 0x339   : > { %v1102_v9 = vpack.c.bf16 %v1101_v8, %v1101_v8 }
 0x33b   : > { %1551 = vmatmul.mubr.bf16.vlgmr.msra.gmra.mrb[12].mxu0 %v1102_v9 }
 0x34b   : > { %v620_v10 = vpop.f32.mrb[8].mxu0  ;;  %v747_v13 = vpop.f32.mrb[8].mxu1 }
 0x34c   : > { %v1504_v15 = vpop.f32.mrb[9].mxu0  ;;  %v1532_v16 = vpop.f32.mrb[9].mxu1 }
 0x34d   : > { %v623_v17 = vpop.f32.mrb[10].mxu0  ;;  %v750_v20 = vpop.f32.mrb[10].mxu1 }
 0x34e   : > { %v1505_v11 = vpop.f32.mrb[11].mxu0  ;;  %v1533_v18 = vpop.f32.mrb[11].mxu1 }
 0x40e   : > { %v1208_v21 = vpop.f32.mrb[12].mxu0 }
 0x40f   : > { %v1209_v19 = vadd.f32 %v1431_v12, %v1208_v21  ;;  %v1552_v22 = vpop.f32.mrb[13].mxu0 }
 0x410   : > { %v1211_v23 = vpop.f32.mrb[14].mxu0 }
 0x411   : > { %1214 = vst [vmem:[%s357_s17] sm:$0xff] %v1209_v19  ;;  %v1553_v24 = vpop.f32.mrb[15].mxu0 }
 0x412   : > { %1852 = shalt.err (!%p1849_p2)
}
 0x413   : > { %s1853_s23 = scalar_lea.hbm %s2280_s26, 128  ;;  %s1857_s3 = scalar_lea.hbm %s2340_s9, 256 }
 0x414   : > { %p1854_p3 = scmp.ne.s32.totalorder %s2280_s26, %s1853_s23  ;;  %p1858_p7 = scmp.lt.u32.totalorder %s2280_s26, %s2340_s9 }
 0x415   : > { %p1859_p9 = scmp.lt.u32.totalorder %s1857_s3, %s1853_s23  ;;  %p1861_p4 = scmp.lt.u32.totalorder %s1853_s23, %s2280_s26 }
 0x416   : > { %p1855_p5 = pnand %p1854_p3, %p2370_p1 }
 0x417   : > { %p1860_p12 = por %p1859_p9, %p1858_p7 }
 0x418   : > { %p1856_p6 = pneg %p1855_p5 }
 0x419   : > { %p1862_p13 = por %p1861_p4, %p1860_p12 }
 0x41b   : > { %p1863_p8 = pnand %p1862_p13, %p1856_p6 }
 0x41d   : > { %1866 = shalt.err (!%p1863_p8)
}
 0x41e   : > { %1570 = dma.vmem_to_hbm [thread:$0]  (%p2370_p1), %s2282_s24, 128, %s2280_s26, %s1216_s12  }
 0x41f PF: > { %s2371_s18 = sld [smem:[#allocation25_spill]]  ;;  %s2372_s15 = sld [smem:[#allocation29_spill]] }
 0x420   : > { %p1597_p10 = scmp.ge.s32.totalorder %s1931_s14, 2 }
 0x425   : > { %s1242_s20 = sand.u32 1, %s2371_s18   ;;  %p2373_p11 = scmp.ne.s32.totalorder %s2372_s15, 0 }
 0x426   : > { %s1243_s28 = scalar_lea.sflag [#allocation7], %s1242_s20 }
 0x427   : > { %p1586_p0 = pnand %p1597_p10, %p2373_p11 }
 0x429   : > { %1906 = dma.done.wait (!%p1586_p0), %s1243_s28, 128  }
 0x42a   : > { %1908 = vsyncadd (!%p1586_p0), %s1243_s28, 4294967168  ;;  %s25_s14 = sadd.s32 1, %s1931_s14   ;;  %s2374_s13 = sld [smem:[#allocation26_spill]] }
 0x42b   : > { %p22_p2 = scmp.ge.s32.totalorder %s25_s14, 4   ;;  %s2375_s11 = sld [smem:[#allocation30_spill]] }
 0x42c   : > { %s2376_s12 = sld [smem:[#allocation27_spill]]  ;;  %s2377_s19 = sld [smem:[#allocation28_spill]] }
 0x42d   : > { %s2378_s30 = smov %s1915_s10  ;;  %24 = sbr.rel (!%p22_p2) target bundleno = 9 (0x9), region = 124 }
 0x430   : > { %s2379_s10 = smov %s2374_s13 }
 0x432   : > { %s2380_s13 = smov %s2377_s19 }
 0x434   :  { %1248 = vsyncpa [#allocation6], 1 }
 0x435   :  { %1250 = vsyncpa [#allocation6 + $0x1], 1 }
 0x436   :  { %1251 = vsyncpa [#allocation9], 1 }
 0x437   :  { %1252 = vsyncpa [#allocation12], 1 }
 0x438   :  { %1253 = vsyncpa [#allocation7], 1 }
 0x439   :  { %1255 = vsyncpa [#allocation7 + $0x1], 1 }
 0x43a   :  { %1256 = vsyncmov [#allocation3] }
 0x43d   :  { %s1257_s24 = vpop.sfrf %1256 }
 0x43e   :  { %p1444_p1 = scmp.ne.s32.totalorder %s1257_s24, 0 }
 0x440   :  { %1261 = shalt.err (%p1444_p1)  }
 0x441   :  { %1263 = vsyncmov [#allocation3 + $0x1] }
 0x444   :  { %s1264_s29 = vpop.sfrf %1263 }
 0x445   :  { %p1445_p3 = scmp.ne.s32.totalorder %s1264_s29, 0 }
 0x447   :  { %1268 = shalt.err (%p1445_p3)  }

</bundles_post_ra>
